<compile_context>
chip_gen: v5e
topology: v5e:2x2
jax: 0.10.0
libtpu: 0.0.40
codegen_flags: <defaults>
</compile_context>

<pallas_src>
import functools

import jax
import jax.numpy as jnp
import numpy as np
from jax import lax
from jax.experimental import pallas as pl
from jax.experimental.pallas import tpu as pltpu


LANES = 128  # pad channel dims to the TPU lane width for lane-dense compute


# ------------------------------ fused Pallas kernel ------------------------------ #
def _make_fused_tcn_kernel(layer_cfgs, *, L, K, Cp, pad_off, pad_max, cin0,
                           ch_last, Bt):
    """Fused kernel for the whole TemporalConvNet stack.

    Refs (in order): x_ref, per-layer weights [w1(or fused w1+wd), b1(or fused),
    w2, b2], o_ref, then two bf16 VMEM scratch buffers (padded layer-input and
    padded conv1-output).
    """
    n_w = 4 * len(layer_cfgs)
    Lp_buf = pad_off + L + pad_max
    n_layers = len(layer_cfgs)

    def kernel(x_ref, *refs):
        w_refs = refs[:n_w]
        o_ref = refs[n_w]
        buf_in, buf_mid = refs[n_w + 1], refs[n_w + 2]

        # Zero only the boundary (padding) rows; interiors are fully overwritten.
        # Re-done every grid step so the batch axis is truly "parallel"
        # (per-core scratch on megacore parts) -- do NOT gate behind pl.when.
        z_lead = jnp.zeros((Bt, pad_off, Cp), jnp.bfloat16)
        z_tail = jnp.zeros((Bt, pad_max, Cp), jnp.bfloat16)
        buf_in[:, 0:pad_off, :] = z_lead
        buf_in[:, pad_off + L:Lp_buf, :] = z_tail
        buf_mid[:, 0:pad_off, :] = z_lead
        buf_mid[:, pad_off + L:Lp_buf, :] = z_tail

        # Stage the (bf16) network input lane-padded to Cp channels: plain
        # zero-concat -- no selection matmul, no per-step iota construction.
        x_in = x_ref[...]
        if cin0 < Cp:
            x_in = jnp.concatenate(
                [x_in, jnp.zeros((Bt, L, Cp - cin0), jnp.bfloat16)], axis=-1)
        buf_in[:, pad_off:pad_off + L, :] = x_in

        def conv_taps(buf, dil):
            # Fold the K dilated taps into ONE wide-contraction MXU matmul input:
            # (Bt*L, K*Cp).
            pad_l = (K - 1) // 2 * dil
            base = pad_off - pad_l
            taps = [buf[:, base + k * dil: base + k * dil + L, :]
                    for k in range(K)]
            return jnp.concatenate(taps, axis=-1).reshape(Bt * L, K * Cp)

        widx = 0
        out_act = None
        for li, cfg in enumerate(layer_cfgs):
            dil = cfg["dilation"]
            w1, b1, w2, b2 = w_refs[widx:widx + 4]
            widx += 4

            # conv1; on downsample layers the 1x1 residual weight is packed into
            # an extra Cp output columns (center-tap rows only) so ONE matmul of
            # shape (Bt*L, K*Cp) @ (K*Cp, 2*Cp) yields both h1 and res and fills
            # the 256-wide MXU on v6e/v7x.
            y1 = jnp.dot(conv_taps(buf_in, dil), w1[...],
                         preferred_element_type=jnp.float32)
            y1 = y1.reshape(Bt, L, -1) + b1[...]          # f32 bias add
            if cfg["downsample"]:
                h1 = jnp.maximum(y1[:, :, :Cp], 0.0)
                res = y1[:, :, Cp:]
            else:
                h1 = jnp.maximum(y1, 0.0)
                res = buf_in[:, pad_off:pad_off + L, :].astype(jnp.float32)

            buf_mid[:, pad_off:pad_off + L, :] = h1.astype(jnp.bfloat16)

            y2 = jnp.dot(conv_taps(buf_mid, dil), w2[...],
                         preferred_element_type=jnp.float32)
            h2 = jnp.maximum(y2.reshape(Bt, L, Cp) + b2[...], 0.0)

            out_act = jnp.maximum(h2 + res, 0.0)          # residual add in f32
            if li + 1 < n_layers:                         # next block stays in VMEM
                buf_in[:, pad_off:pad_off + L, :] = out_act.astype(jnp.bfloat16)

        # Store only the real output channels (much less HBM writeback than the
        # full 128-lane padded f32 slab; block dims equal full array dims).
        o_ref[...] = out_act[:, :, :ch_last]

    return kernel, n_w


# -------------------------- weight packing (wrapper side) ------------------------- #
def _pack_conv_weight(w_kio, Cp):
    K, ci, co = w_kio.shape
    wp = jnp.zeros((K, Cp, Cp), jnp.float32).at[:, :ci, :co].set(w_kio)
    return wp.reshape(K * Cp, Cp).astype(jnp.bfloat16)


def _pack_conv1_fused(w1_kio, wd_io, Cp):
    """conv1 weight + 1x1 downsample weight packed into one (K*Cp, 2*Cp) matrix."""
    K, ci, co = w1_kio.shape
    cid, cod = wd_io.shape
    wp = jnp.zeros((K, Cp, 2 * Cp), jnp.float32)
    wp = wp.at[:, :ci, :co].set(w1_kio)
    wp = wp.at[(K - 1) // 2, :cid, Cp:Cp + cod].set(wd_io)   # center tap == x[t]
    return wp.reshape(K * Cp, 2 * Cp).astype(jnp.bfloat16)


def _pack_bias(b, Cp):
    co = b.shape[-1]
    return jnp.zeros((1, Cp), jnp.float32).at[:, :co].set(b.reshape(1, co))


def _pack_bias_fused(b1, bd, Cp):
    return jnp.concatenate([_pack_bias(b1, Cp), _pack_bias(bd, Cp)], axis=-1)


# ------------------------------ tiling / VMEM budget ------------------------------ #
def _vmem_limit_bytes():
    """Generation-aware limit: ~3/4 of physical VMEM, capped at 96 MiB.
    (v5e/v6e: 128 MiB -> 96 MiB; v7x: 64 MiB -> 48 MiB.)"""
    try:
        cap = int(pltpu.get_tpu_info().vmem_capacity_bytes)
    except Exception:
        cap = 64 * 1024 * 1024
    return int(min(cap * 3 // 4, 96 * 1024 * 1024))


def _pick_bt(B, L, cin0, ch_last, Cp, K, Lp_buf, weight_bytes, vmem_limit):
    """Largest batch tile (divisor of B) whose real working set fits the limit."""
    per_row = (2 * Lp_buf * Cp * 2        # two bf16 scratch buffers
               + 2 * L * cin0 * 2         # double-buffered bf16 input
               + 2 * L * ch_last * 4      # double-buffered f32 output
               + L * K * Cp * 2           # bf16 tap-concat temporary
               + L * 2 * Cp * 4           # widest matmul result (f32)
               + 6 * L * Cp * 4)          # misc f32 temporaries (h1,h2,res,out,...)
    budget = vmem_limit - 2 * weight_bytes - (2 << 20)      # weights double-buffered
    cap = max(1, budget // per_row)
    bt = 1
    for d in range(1, B + 1):
        if B % d == 0 and d <= cap:
            bt = d
    return bt


# ---------------------------------- forward pass ---------------------------------- #
def vanilla_tcn_forward(x_ncl, params, kernel_size):
    """x_ncl: (B, input_dim, L) like PyTorch Conv1d -> (B, layers[-1], L)."""
    assert kernel_size % 2 == 1 and kernel_size > 1
    # channels-last, bf16 activations (halves input DMA; matmul inputs were bf16 anyway)
    x = jnp.transpose(x_ncl, (0, 2, 1)).astype(jnp.bfloat16)
    B, L, cin0 = x.shape
    K = kernel_size
    Cp = LANES
    n_layers = len(params)
    pad_max = (K - 1) // 2 * (2 ** (n_layers - 1))
    pad_off = max(8, ((pad_max + 7) // 8) * 8)               # sublane-aligned interior
    Lp_buf = pad_off + L + pad_max

    layer_cfgs, flat_w = [], []
    cin = cin0
    ch_last = cin0
    for i, (w1, b1, w2, b2, wd, bd) in enumerate(params):
        ch = w1.shape[2]
        assert cin <= Cp and ch <= Cp, "channel counts must fit the 128-lane padding"
        downsample = wd is not None
        layer_cfgs.append({"dilation": 2 ** i, "downsample": downsample})
        if downsample:
            flat_w += [_pack_conv1_fused(w1, wd, Cp), _pack_bias_fused(b1, bd, Cp)]
        else:
            flat_w += [_pack_conv_weight(w1, Cp), _pack_bias(b1, Cp)]
        flat_w += [_pack_conv_weight(w2, Cp), _pack_bias(b2, Cp)]
        cin = ch
        ch_last = ch

    weight_bytes = sum(int(np.prod(w.shape)) * w.dtype.itemsize for w in flat_w)
    vmem_limit = _vmem_limit_bytes()
    Bt = _pick_bt(B, L, cin0, ch_last, Cp, K, Lp_buf, weight_bytes, vmem_limit)
    # TODO(synk): add an L-tiling (sequence-chunk + receptive-field halo) path so
    # very long sequences still fit v7x's 64 MiB VMEM even at Bt=1.

    kernel, _ = _make_fused_tcn_kernel(
        layer_cfgs, L=L, K=K, Cp=Cp, pad_off=pad_off, pad_max=pad_max,
        cin0=cin0, ch_last=ch_last, Bt=Bt)

    w_specs = [pl.BlockSpec(w.shape, lambda b: (0, 0)) for w in flat_w]

    flops = 0
    for cfg in layer_cfgs:
        ow = 2 * Cp if cfg["downsample"] else Cp
        flops += 2 * B * L * (K * Cp) * ow + 2 * B * L * (K * Cp) * Cp
    cost = pl.CostEstimate(
        flops=flops, transcendentals=0,
        bytes_accessed=B * L * cin0 * 2 + weight_bytes + B * L * ch_last * 4)

    out = pl.pallas_call(
        kernel,
        out_shape=jax.ShapeDtypeStruct((B, L, ch_last), jnp.float32),
        grid_spec=pltpu.PrefetchScalarGridSpec(
            num_scalar_prefetch=0,
            grid=(B // Bt,),
            in_specs=[pl.BlockSpec((Bt, L, cin0), lambda b: (b, 0, 0))] + w_specs,
            out_specs=pl.BlockSpec((Bt, L, ch_last), lambda b: (b, 0, 0)),
            scratch_shapes=[pltpu.VMEM((Bt, Lp_buf, Cp), jnp.bfloat16),
                            pltpu.VMEM((Bt, Lp_buf, Cp), jnp.bfloat16)],
        ),
        compiler_params=pltpu.CompilerParams(
            dimension_semantics=("parallel",),   # batch rows are independent
            vmem_limit_bytes=vmem_limit,
        ),
        cost_estimate=cost,
    )(x, *flat_w)

    return jnp.transpose(out, (0, 2, 1))                     # back to PyTorch NCL layout


def init_params(key, input_dim, layers, kernel_size):
    params = []
    cin = input_dim
    for ch in layers:
        key, k1, k2, k3, k4, k5, k6 = jax.random.split(key, 7)
        w1 = 0.05 * jax.random.normal(k1, (kernel_size, cin, ch), jnp.float32)
        b1 = 0.05 * jax.random.normal(k2, (1, ch), jnp.float32)
        w2 = 0.05 * jax.random.normal(k3, (kernel_size, ch, ch), jnp.float32)
        b2 = 0.05 * jax.random.normal(k4, (1, ch), jnp.float32)
        if cin != ch:
            wd = 0.05 * jax.random.normal(k5, (cin, ch), jnp.float32)
            bd = 0.05 * jax.random.normal(k6, (1, ch), jnp.float32)
        else:
            wd, bd = None, None
        params.append((w1, b1, w2, b2, wd, bd))
        cin = ch
    return params


# ------------------------ pure-JAX reference (for checking) ------------------------ #
def _conv1d_ref(x_blc, w_kio, b, dilation, pad):
    w = jnp.transpose(w_kio, (2, 1, 0))                      # (Cout, Cin, K)
    y = lax.conv_general_dilated(
        jnp.transpose(x_blc, (0, 2, 1)), w, window_strides=(1,),
        padding=[(pad, pad)], rhs_dilation=(dilation,),
        dimension_numbers=('NCH', 'OIH', 'NCH'))
    y = y + b.reshape(1, -1, 1)
    return jnp.transpose(y, (0, 2, 1))


def ref_forward(x_ncl, params, kernel_size):
    x = jnp.transpose(x_ncl, (0, 2, 1)).astype(jnp.float32)
    for i, (w1, b1, w2, b2, wd, bd) in enumerate(params):
        dil = 2 ** i
        pad = (kernel_size - 1) // 2 * dil
        h = jax.nn.relu(_conv1d_ref(x, w1, b1, dil, pad))
        h = jax.nn.relu(_conv1d_ref(h, w2, b2, dil, pad))
        res = x if wd is None else jnp.einsum('blc,cd->bld', x, wd) + bd
        x = jax.nn.relu(h + res)
    return jnp.transpose(x, (0, 2, 1))


# --------------------------------------- main --------------------------------------- #
if __name__ == "__main__":
    B, input_dim, L = 2, 8, 32
    layers = [16, 16]          # block 0 has a 1x1 downsample (8->16), block 1 does not
    kernel_size = 3
    dropout = 0.1              # inactive at inference

    key = jax.random.PRNGKey(0)
    key, kx = jax.random.split(key)
    x = jax.random.normal(kx, (B, input_dim, L), jnp.float32)    # PyTorch NCL layout

    params = init_params(key, input_dim, layers, kernel_size)

    fwd = jax.jit(functools.partial(vanilla_tcn_forward, kernel_size=kernel_size))
    out = jax.block_until_ready(fwd(x, params))

    ref = jax.block_until_ready(ref_forward(x, params, kernel_size))
    assert out.shape == (B, layers[-1], L)
    # bf16 MXU inputs / bf16 activation scratch (f32 accumulation) -> compare loosely.
    assert jnp.allclose(out, ref, atol=3e-2, rtol=3e-2), "mismatch vs reference"

    print("KERNEL_OK")
</pallas_src>

<mosaic_0001>
module attributes {stable_mosaic.version = 11 : i64} {
  func.func @kernel(%arg0: i32, %arg1: memref<2x32x8xbf16, #tpu.memory_space<vmem>>, %arg2: memref<384x256xbf16, #tpu.memory_space<vmem>>, %arg3: memref<1x256xf32, #tpu.memory_space<vmem>>, %arg4: memref<384x128xbf16, #tpu.memory_space<vmem>>, %arg5: memref<1x128xf32, #tpu.memory_space<vmem>>, %arg6: memref<384x128xbf16, #tpu.memory_space<vmem>>, %arg7: memref<1x128xf32, #tpu.memory_space<vmem>>, %arg8: memref<384x128xbf16, #tpu.memory_space<vmem>>, %arg9: memref<1x128xf32, #tpu.memory_space<vmem>>, %arg10: memref<2x32x16xf32, #tpu.memory_space<vmem>>, %arg11: memref<2x42x128xbf16, #tpu.memory_space<vmem>>, %arg12: memref<2x42x128xbf16, #tpu.memory_space<vmem>>) attributes {dimension_semantics = [#tpu.dimension_semantics<parallel>], iteration_bounds = array<i64: 1>, scalar_prefetch = 0 : i64, scratch_operands = 2 : i64, tpu.core_type = #tpu.core_type<tc>, window_params = [{transform_indices = @transform_0, window_bounds = array<i64: 2, 32, 8>}, {pipeline_mode = #tpu.pipeline_mode<synchronous>, transform_indices = @transform_1, window_bounds = array<i64: 384, 256>}, {pipeline_mode = #tpu.pipeline_mode<synchronous>, transform_indices = @transform_2, window_bounds = array<i64: 1, 256>}, {pipeline_mode = #tpu.pipeline_mode<synchronous>, transform_indices = @transform_3, window_bounds = array<i64: 384, 128>}, {pipeline_mode = #tpu.pipeline_mode<synchronous>, transform_indices = @transform_4, window_bounds = array<i64: 1, 128>}, {pipeline_mode = #tpu.pipeline_mode<synchronous>, transform_indices = @transform_5, window_bounds = array<i64: 384, 128>}, {pipeline_mode = #tpu.pipeline_mode<synchronous>, transform_indices = @transform_6, window_bounds = array<i64: 1, 128>}, {pipeline_mode = #tpu.pipeline_mode<synchronous>, transform_indices = @transform_7, window_bounds = array<i64: 384, 128>}, {pipeline_mode = #tpu.pipeline_mode<synchronous>, transform_indices = @transform_8, window_bounds = array<i64: 1, 128>}, {transform_indices = @transform_9, window_bounds = array<i64: 2, 32, 16>}]} {
    %cst = arith.constant 0.000000e+00 : bf16
    %0 = vector.broadcast %cst : bf16 to vector<2x8x128xbf16>
    %cst_0 = arith.constant 0.000000e+00 : bf16
    %1 = vector.broadcast %cst_0 : bf16 to vector<2x2x128xbf16>
    %c0 = arith.constant 0 : index
    %c0_1 = arith.constant 0 : index
    %c0_2 = arith.constant 0 : index
    %2 = vector.load %arg11[%c0, %c0_1, %c0_2] : memref<2x42x128xbf16, #tpu.memory_space<vmem>>, vector<2x8x128xbf16>
    tpu.vector_store %arg11[%c0, %c0_1, %c0_2], %0 {strides = array<i32>} : memref<2x42x128xbf16, #tpu.memory_space<vmem>>, vector<2x8x128xbf16>,
    %c0_3 = arith.constant 0 : index
    %c40 = arith.constant 40 : index
    %c0_4 = arith.constant 0 : index
    %3 = vector.load %arg11[%c0_3, %c40, %c0_4] : memref<2x42x128xbf16, #tpu.memory_space<vmem>>, vector<2x2x128xbf16>
    tpu.vector_store %arg11[%c0_3, %c40, %c0_4], %1 {strides = array<i32>} : memref<2x42x128xbf16, #tpu.memory_space<vmem>>, vector<2x2x128xbf16>,
    %c0_5 = arith.constant 0 : index
    %c0_6 = arith.constant 0 : index
    %c0_7 = arith.constant 0 : index
    %4 = vector.load %arg12[%c0_5, %c0_6, %c0_7] : memref<2x42x128xbf16, #tpu.memory_space<vmem>>, vector<2x8x128xbf16>
    tpu.vector_store %arg12[%c0_5, %c0_6, %c0_7], %0 {strides = array<i32>} : memref<2x42x128xbf16, #tpu.memory_space<vmem>>, vector<2x8x128xbf16>,
    %c0_8 = arith.constant 0 : index
    %c40_9 = arith.constant 40 : index
    %c0_10 = arith.constant 0 : index
    %5 = vector.load %arg12[%c0_8, %c40_9, %c0_10] : memref<2x42x128xbf16, #tpu.memory_space<vmem>>, vector<2x2x128xbf16>
    tpu.vector_store %arg12[%c0_8, %c40_9, %c0_10], %1 {strides = array<i32>} : memref<2x42x128xbf16, #tpu.memory_space<vmem>>, vector<2x2x128xbf16>,
    %c0_11 = arith.constant 0 : index
    %c0_12 = arith.constant 0 : index
    %c0_13 = arith.constant 0 : index
    %6 = vector.load %arg1[%c0_11, %c0_12, %c0_13] : memref<2x32x8xbf16, #tpu.memory_space<vmem>>, vector<2x32x8xbf16>
    %cst_14 = arith.constant 0.000000e+00 : bf16
    %7 = vector.broadcast %cst_14 : bf16 to vector<2x32x120xbf16>
    %8 = tpu.concatenate %6, %7 in 2 : vector<2x32x8xbf16>, vector<2x32x120xbf16> -> vector<2x32x128xbf16>
    %c0_15 = arith.constant 0 : index
    %c8 = arith.constant 8 : index
    %c0_16 = arith.constant 0 : index
    %9 = vector.load %arg11[%c0_15, %c8, %c0_16] : memref<2x42x128xbf16, #tpu.memory_space<vmem>>, vector<2x32x128xbf16>
    tpu.vector_store %arg11[%c0_15, %c8, %c0_16], %8 {strides = array<i32>} : memref<2x42x128xbf16, #tpu.memory_space<vmem>>, vector<2x32x128xbf16>,
    %c0_17 = arith.constant 0 : index
    %c7 = arith.constant 7 : index
    %c0_18 = arith.constant 0 : index
    %10 = vector.load %arg11[%c0_17, %c7, %c0_18] : memref<2x42x128xbf16, #tpu.memory_space<vmem>>, vector<2x32x128xbf16>
    %c0_19 = arith.constant 0 : index
    %c8_20 = arith.constant 8 : index
    %c0_21 = arith.constant 0 : index
    %11 = vector.load %arg11[%c0_19, %c8_20, %c0_21] : memref<2x42x128xbf16, #tpu.memory_space<vmem>>, vector<2x32x128xbf16>
    %c0_22 = arith.constant 0 : index
    %c9 = arith.constant 9 : index
    %c0_23 = arith.constant 0 : index
    %12 = vector.load %arg11[%c0_22, %c9, %c0_23] : memref<2x42x128xbf16, #tpu.memory_space<vmem>>, vector<2x32x128xbf16>
    %13 = tpu.concatenate %10, %11, %12 in 2 : vector<2x32x128xbf16>, vector<2x32x128xbf16>, vector<2x32x128xbf16> -> vector<2x32x384xbf16>
    %14 = vector.shape_cast %13 : vector<2x32x384xbf16> to vector<64x384xbf16>
    %c0_24 = arith.constant 0 : index
    %c0_25 = arith.constant 0 : index
    %15 = vector.load %arg2[%c0_24, %c0_25] : memref<384x256xbf16, #tpu.memory_space<vmem>>, vector<384x256xbf16>
    %cst_26 = arith.constant dense<0.000000e+00> : vector<64x256xf32>
    %16 = tpu.matmul %14, %15, %cst_26 {dimension_numbers = #tpu.dot_dimension_numbers<[1], [0], [0], [1], [0, 0, 1, 1], [], []>} : vector<64x384xbf16>, vector<384x256xbf16>, vector<64x256xf32> -> vector<64x256xf32>
    %17 = vector.shape_cast %16 : vector<64x256xf32> to vector<2x32x256xf32>
    %c0_27 = arith.constant 0 : index
    %c0_28 = arith.constant 0 : index
    %18 = vector.load %arg3[%c0_27, %c0_28] : memref<1x256xf32, #tpu.memory_space<vmem>>, vector<1x256xf32>
    %19 = vector.shape_cast %18 : vector<1x256xf32> to vector<1x1x256xf32>
    %20 = vector.broadcast %19 : vector<1x1x256xf32> to vector<2x32x256xf32>
    %21 = arith.addf %17, %20 : vector<2x32x256xf32>
    %22 = vector.extract_strided_slice %21 {offsets = [0, 0, 0], sizes = [2, 32, 128], strides = [1, 1, 1]} : vector<2x32x256xf32> to vector<2x32x128xf32>
    %cst_29 = arith.constant 0.000000e+00 : f32
    %23 = vector.broadcast %cst_29 : f32 to vector<2x32x128xf32>
    %24 = arith.maximumf %22, %23 : vector<2x32x128xf32>
    %25 = vector.extract_strided_slice %21 {offsets = [0, 0, 128], sizes = [2, 32, 128], strides = [1, 1, 1]} : vector<2x32x256xf32> to vector<2x32x128xf32>
    %26 = arith.truncf %24 : vector<2x32x128xf32> to vector<2x32x128xbf16>
    %c0_30 = arith.constant 0 : index
    %c8_31 = arith.constant 8 : index
    %c0_32 = arith.constant 0 : index
    %27 = vector.load %arg12[%c0_30, %c8_31, %c0_32] : memref<2x42x128xbf16, #tpu.memory_space<vmem>>, vector<2x32x128xbf16>
    tpu.vector_store %arg12[%c0_30, %c8_31, %c0_32], %26 {strides = array<i32>} : memref<2x42x128xbf16, #tpu.memory_space<vmem>>, vector<2x32x128xbf16>,
    %c0_33 = arith.constant 0 : index
    %c7_34 = arith.constant 7 : index
    %c0_35 = arith.constant 0 : index
    %28 = vector.load %arg12[%c0_33, %c7_34, %c0_35] : memref<2x42x128xbf16, #tpu.memory_space<vmem>>, vector<2x32x128xbf16>
    %c0_36 = arith.constant 0 : index
    %c8_37 = arith.constant 8 : index
    %c0_38 = arith.constant 0 : index
    %29 = vector.load %arg12[%c0_36, %c8_37, %c0_38] : memref<2x42x128xbf16, #tpu.memory_space<vmem>>, vector<2x32x128xbf16>
    %c0_39 = arith.constant 0 : index
    %c9_40 = arith.constant 9 : index
    %c0_41 = arith.constant 0 : index
    %30 = vector.load %arg12[%c0_39, %c9_40, %c0_41] : memref<2x42x128xbf16, #tpu.memory_space<vmem>>, vector<2x32x128xbf16>
    %31 = tpu.concatenate %28, %29, %30 in 2 : vector<2x32x128xbf16>, vector<2x32x128xbf16>, vector<2x32x128xbf16> -> vector<2x32x384xbf16>
    %32 = vector.shape_cast %31 : vector<2x32x384xbf16> to vector<64x384xbf16>
    %c0_42 = arith.constant 0 : index
    %c0_43 = arith.constant 0 : index
    %33 = vector.load %arg4[%c0_42, %c0_43] : memref<384x128xbf16, #tpu.memory_space<vmem>>, vector<384x128xbf16>
    %cst_44 = arith.constant dense<0.000000e+00> : vector<64x128xf32>
    %34 = tpu.matmul %32, %33, %cst_44 {dimension_numbers = #tpu.dot_dimension_numbers<[1], [0], [0], [1], [0, 0, 1, 1], [], []>} : vector<64x384xbf16>, vector<384x128xbf16>, vector<64x128xf32> -> vector<64x128xf32>
    %35 = vector.shape_cast %34 : vector<64x128xf32> to vector<2x32x128xf32>
    %c0_45 = arith.constant 0 : index
    %c0_46 = arith.constant 0 : index
    %36 = vector.load %arg5[%c0_45, %c0_46] : memref<1x128xf32, #tpu.memory_space<vmem>>, vector<1x128xf32>
    %37 = vector.shape_cast %36 : vector<1x128xf32> to vector<1x1x128xf32>
    %38 = vector.broadcast %37 : vector<1x1x128xf32> to vector<2x32x128xf32>
    %39 = arith.addf %35, %38 : vector<2x32x128xf32>
    %cst_47 = arith.constant 0.000000e+00 : f32
    %40 = vector.broadcast %cst_47 : f32 to vector<2x32x128xf32>
    %41 = arith.maximumf %39, %40 : vector<2x32x128xf32>
    %42 = arith.addf %41, %25 : vector<2x32x128xf32>
    %cst_48 = arith.constant 0.000000e+00 : f32
    %43 = vector.broadcast %cst_48 : f32 to vector<2x32x128xf32>
    %44 = arith.maximumf %42, %43 : vector<2x32x128xf32>
    %45 = arith.truncf %44 : vector<2x32x128xf32> to vector<2x32x128xbf16>
    %c0_49 = arith.constant 0 : index
    %c8_50 = arith.constant 8 : index
    %c0_51 = arith.constant 0 : index
    %46 = vector.load %arg11[%c0_49, %c8_50, %c0_51] : memref<2x42x128xbf16, #tpu.memory_space<vmem>>, vector<2x32x128xbf16>
    tpu.vector_store %arg11[%c0_49, %c8_50, %c0_51], %45 {strides = array<i32>} : memref<2x42x128xbf16, #tpu.memory_space<vmem>>, vector<2x32x128xbf16>,
    %c0_52 = arith.constant 0 : index
    %c6 = arith.constant 6 : index
    %c0_53 = arith.constant 0 : index
    %47 = vector.load %arg11[%c0_52, %c6, %c0_53] : memref<2x42x128xbf16, #tpu.memory_space<vmem>>, vector<2x32x128xbf16>
    %c0_54 = arith.constant 0 : index
    %c8_55 = arith.constant 8 : index
    %c0_56 = arith.constant 0 : index
    %48 = vector.load %arg11[%c0_54, %c8_55, %c0_56] : memref<2x42x128xbf16, #tpu.memory_space<vmem>>, vector<2x32x128xbf16>
    %c0_57 = arith.constant 0 : index
    %c10 = arith.constant 10 : index
    %c0_58 = arith.constant 0 : index
    %49 = vector.load %arg11[%c0_57, %c10, %c0_58] : memref<2x42x128xbf16, #tpu.memory_space<vmem>>, vector<2x32x128xbf16>
    %50 = tpu.concatenate %47, %48, %49 in 2 : vector<2x32x128xbf16>, vector<2x32x128xbf16>, vector<2x32x128xbf16> -> vector<2x32x384xbf16>
    %51 = vector.shape_cast %50 : vector<2x32x384xbf16> to vector<64x384xbf16>
    %c0_59 = arith.constant 0 : index
    %c0_60 = arith.constant 0 : index
    %52 = vector.load %arg6[%c0_59, %c0_60] : memref<384x128xbf16, #tpu.memory_space<vmem>>, vector<384x128xbf16>
    %cst_61 = arith.constant dense<0.000000e+00> : vector<64x128xf32>
    %53 = tpu.matmul %51, %52, %cst_61 {dimension_numbers = #tpu.dot_dimension_numbers<[1], [0], [0], [1], [0, 0, 1, 1], [], []>} : vector<64x384xbf16>, vector<384x128xbf16>, vector<64x128xf32> -> vector<64x128xf32>
    %54 = vector.shape_cast %53 : vector<64x128xf32> to vector<2x32x128xf32>
    %c0_62 = arith.constant 0 : index
    %c0_63 = arith.constant 0 : index
    %55 = vector.load %arg7[%c0_62, %c0_63] : memref<1x128xf32, #tpu.memory_space<vmem>>, vector<1x128xf32>
    %56 = vector.shape_cast %55 : vector<1x128xf32> to vector<1x1x128xf32>
    %57 = vector.broadcast %56 : vector<1x1x128xf32> to vector<2x32x128xf32>
    %58 = arith.addf %54, %57 : vector<2x32x128xf32>
    %cst_64 = arith.constant 0.000000e+00 : f32
    %59 = vector.broadcast %cst_64 : f32 to vector<2x32x128xf32>
    %60 = arith.maximumf %58, %59 : vector<2x32x128xf32>
    %c0_65 = arith.constant 0 : index
    %c8_66 = arith.constant 8 : index
    %c0_67 = arith.constant 0 : index
    %61 = vector.load %arg11[%c0_65, %c8_66, %c0_67] : memref<2x42x128xbf16, #tpu.memory_space<vmem>>, vector<2x32x128xbf16>
    %62 = arith.extf %61 : vector<2x32x128xbf16> to vector<2x32x128xf32>
    %63 = arith.truncf %60 : vector<2x32x128xf32> to vector<2x32x128xbf16>
    %c0_68 = arith.constant 0 : index
    %c8_69 = arith.constant 8 : index
    %c0_70 = arith.constant 0 : index
    %64 = vector.load %arg12[%c0_68, %c8_69, %c0_70] : memref<2x42x128xbf16, #tpu.memory_space<vmem>>, vector<2x32x128xbf16>
    tpu.vector_store %arg12[%c0_68, %c8_69, %c0_70], %63 {strides = array<i32>} : memref<2x42x128xbf16, #tpu.memory_space<vmem>>, vector<2x32x128xbf16>,
    %c0_71 = arith.constant 0 : index
    %c6_72 = arith.constant 6 : index
    %c0_73 = arith.constant 0 : index
    %65 = vector.load %arg12[%c0_71, %c6_72, %c0_73] : memref<2x42x128xbf16, #tpu.memory_space<vmem>>, vector<2x32x128xbf16>
    %c0_74 = arith.constant 0 : index
    %c8_75 = arith.constant 8 : index
    %c0_76 = arith.constant 0 : index
    %66 = vector.load %arg12[%c0_74, %c8_75, %c0_76] : memref<2x42x128xbf16, #tpu.memory_space<vmem>>, vector<2x32x128xbf16>
    %c0_77 = arith.constant 0 : index
    %c10_78 = arith.constant 10 : index
    %c0_79 = arith.constant 0 : index
    %67 = vector.load %arg12[%c0_77, %c10_78, %c0_79] : memref<2x42x128xbf16, #tpu.memory_space<vmem>>, vector<2x32x128xbf16>
    %68 = tpu.concatenate %65, %66, %67 in 2 : vector<2x32x128xbf16>, vector<2x32x128xbf16>, vector<2x32x128xbf16> -> vector<2x32x384xbf16>
    %69 = vector.shape_cast %68 : vector<2x32x384xbf16> to vector<64x384xbf16>
    %c0_80 = arith.constant 0 : index
    %c0_81 = arith.constant 0 : index
    %70 = vector.load %arg8[%c0_80, %c0_81] : memref<384x128xbf16, #tpu.memory_space<vmem>>, vector<384x128xbf16>
    %cst_82 = arith.constant dense<0.000000e+00> : vector<64x128xf32>
    %71 = tpu.matmul %69, %70, %cst_82 {dimension_numbers = #tpu.dot_dimension_numbers<[1], [0], [0], [1], [0, 0, 1, 1], [], []>} : vector<64x384xbf16>, vector<384x128xbf16>, vector<64x128xf32> -> vector<64x128xf32>
    %72 = vector.shape_cast %71 : vector<64x128xf32> to vector<2x32x128xf32>
    %c0_83 = arith.constant 0 : index
    %c0_84 = arith.constant 0 : index
    %73 = vector.load %arg9[%c0_83, %c0_84] : memref<1x128xf32, #tpu.memory_space<vmem>>, vector<1x128xf32>
    %74 = vector.shape_cast %73 : vector<1x128xf32> to vector<1x1x128xf32>
    %75 = vector.broadcast %74 : vector<1x1x128xf32> to vector<2x32x128xf32>
    %76 = arith.addf %72, %75 : vector<2x32x128xf32>
    %cst_85 = arith.constant 0.000000e+00 : f32
    %77 = vector.broadcast %cst_85 : f32 to vector<2x32x128xf32>
    %78 = arith.maximumf %76, %77 : vector<2x32x128xf32>
    %79 = arith.addf %78, %62 : vector<2x32x128xf32>
    %cst_86 = arith.constant 0.000000e+00 : f32
    %80 = vector.broadcast %cst_86 : f32 to vector<2x32x128xf32>
    %81 = arith.maximumf %79, %80 : vector<2x32x128xf32>
    %82 = vector.extract_strided_slice %81 {offsets = [0, 0, 0], sizes = [2, 32, 16], strides = [1, 1, 1]} : vector<2x32x128xf32> to vector<2x32x16xf32>
    %c0_87 = arith.constant 0 : index
    %c0_88 = arith.constant 0 : index
    %c0_89 = arith.constant 0 : index
    %83 = vector.load %arg10[%c0_87, %c0_88, %c0_89] : memref<2x32x16xf32, #tpu.memory_space<vmem>>, vector<2x32x16xf32>
    tpu.vector_store %arg10[%c0_87, %c0_88, %c0_89], %82 {strides = array<i32>} : memref<2x32x16xf32, #tpu.memory_space<vmem>>, vector<2x32x16xf32>,
    return
  }
  func.func @transform_0(%arg0: i32) -> (i32, i32, i32) {
    %c0_i32 = arith.constant 0 : i32
    %c0_i32_0 = arith.constant 0 : i32
    %c0_i32_1 = arith.constant 0 : i32
    return %arg0, %c0_i32, %c0_i32_0 : i32, i32, i32
  }
  func.func @transform_1(%arg0: i32) -> (i32, i32) {
    %c0_i32 = arith.constant 0 : i32
    %c0_i32_0 = arith.constant 0 : i32
    %c0_i32_1 = arith.constant 0 : i32
    return %c0_i32, %c0_i32_0 : i32, i32
  }
  func.func @transform_2(%arg0: i32) -> (i32, i32) {
    %c0_i32 = arith.constant 0 : i32
    %c0_i32_0 = arith.constant 0 : i32
    %c0_i32_1 = arith.constant 0 : i32
    return %c0_i32, %c0_i32_0 : i32, i32
  }
  func.func @transform_3(%arg0: i32) -> (i32, i32) {
    %c0_i32 = arith.constant 0 : i32
    %c0_i32_0 = arith.constant 0 : i32
    %c0_i32_1 = arith.constant 0 : i32
    return %c0_i32, %c0_i32_0 : i32, i32
  }
  func.func @transform_4(%arg0: i32) -> (i32, i32) {
    %c0_i32 = arith.constant 0 : i32
    %c0_i32_0 = arith.constant 0 : i32
    %c0_i32_1 = arith.constant 0 : i32
    return %c0_i32, %c0_i32_0 : i32, i32
  }
  func.func @transform_5(%arg0: i32) -> (i32, i32) {
    %c0_i32 = arith.constant 0 : i32
    %c0_i32_0 = arith.constant 0 : i32
    %c0_i32_1 = arith.constant 0 : i32
    return %c0_i32, %c0_i32_0 : i32, i32
  }
  func.func @transform_6(%arg0: i32) -> (i32, i32) {
    %c0_i32 = arith.constant 0 : i32
    %c0_i32_0 = arith.constant 0 : i32
    %c0_i32_1 = arith.constant 0 : i32
    return %c0_i32, %c0_i32_0 : i32, i32
  }
  func.func @transform_7(%arg0: i32) -> (i32, i32) {
    %c0_i32 = arith.constant 0 : i32
    %c0_i32_0 = arith.constant 0 : i32
    %c0_i32_1 = arith.constant 0 : i32
    return %c0_i32, %c0_i32_0 : i32, i32
  }
  func.func @transform_8(%arg0: i32) -> (i32, i32) {
    %c0_i32 = arith.constant 0 : i32
    %c0_i32_0 = arith.constant 0 : i32
    %c0_i32_1 = arith.constant 0 : i32
    return %c0_i32, %c0_i32_0 : i32, i32
  }
  func.func @transform_9(%arg0: i32) -> (i32, i32, i32) {
    %c0_i32 = arith.constant 0 : i32
    %c0_i32_0 = arith.constant 0 : i32
    %c0_i32_1 = arith.constant 0 : i32
    return %arg0, %c0_i32, %c0_i32_0 : i32, i32, i32
  }
}

</mosaic_0001>

<bundles_post_ra>
// kernel: vanilla_tcn_forward.1
= control target key start
LH: loop header
LB: loop body
LE: loop exit
PB: predicated region body
PF: predicated region fallthrough
CT: control target
= control target key end

     0   :  { %vm69_vm0 = vcmask 64512   ;;  %v3098_v50 = vmov 0   ;;  %vm209_vm1 = vsmask.f32 4352  ;;  %vm157_vm2 = vsmask.f32 3328  ;;  %s4006_s1 = inlined_call_operand.vmem [shape: bf16[384,256], index: 1, kind: input, shape index: {}]   ;;  %s4007_s0 = inlined_call_operand.vmem [shape: bf16[2,32,8], index: 0, kind: input, shape index: {}]   ;;  %s4008_s3 = inlined_call_operand.vmem [shape: bf16[384,128], index: 3, kind: input, shape index: {}]   ;;  %s4009_s2 = inlined_call_operand.vmem [shape: f32[1,256], index: 2, kind: input, shape index: {}]   ;;  %s4010_s4 = inlined_call_operand.vmem [shape: f32[1,128], index: 4, kind: input, shape index: {}]   ;;  %s4011_s5 = inlined_call_operand.vmem [shape: bf16[384,128], index: 5, kind: input, shape index: {}]   ;;  %s4012_s6 = inlined_call_operand.vmem [shape: f32[1,128], index: 6, kind: input, shape index: {}]   ;;  %s4013_s7 = inlined_call_operand.vmem [shape: bf16[384,128], index: 7, kind: input, shape index: {}]   ;;  %s4014_s8 = inlined_call_operand.vmem [shape: f32[1,128], index: 8, kind: input, shape index: {}]   ;;  %s4015_s9 = inlined_call_operand.vmem [shape: f32[2,32,16], index: 9, kind: output, shape index: {}]  }
   0x1   :  { %v2444_v0 = vld [vmem:[%s4006_s1 + $0x70] sm:$0xf]  ;;  %v2885_v1 = vld [vmem:[%s4006_s1 + $0x74] sm:$0xf0]  ;;  %v2436_v9 = vld [vmem:[%s4006_s1 + $0x60] sm:$0xf] }
   0x2   :  { %v2508_v2 = vld [vmem:[%s4006_s1 + $0xf0] sm:$0xf]  ;;  %v2445_v3 = vor.u32 %v2885_v1, %v2444_v0  ;;  %v2901_v4 = vld [vmem:[%s4006_s1 + $0xf4] sm:$0xf0]  ;;  %v2883_v10 = vld [vmem:[%s4006_s1 + $0x64] sm:$0xf0] }
   0x3   :  { %v2572_v5 = vld [vmem:[%s4006_s1 + $0x170] sm:$0xf]  ;;  %v2917_v6 = vld [vmem:[%s4006_s1 + $0x174] sm:$0xf0]  ;;  %v2509_v7 = vor.u32 %v2901_v4, %v2508_v2  ;;  %v2500_v11 = vld [vmem:[%s4006_s1 + $0xe0] sm:$0xf]  ;;  %v2437_v12 = vor.u32 %v2883_v10, %v2436_v9 }
   0x4   :  { %v2573_v8 = vor.u32 %v2917_v6, %v2572_v5  ;;  %666 = vmatpush.bf16.msra.mxu0 %v2445_v3  ;;  %v2899_v13 = vld [vmem:[%s4006_s1 + $0xe4] sm:$0xf0]  ;;  %v2564_v14 = vld [vmem:[%s4006_s1 + $0x160] sm:$0xf]  ;;  %3070 = vmatpush.bf16.msra.mxu3 %v2445_v3  ;;  %v2428_v18 = vld [vmem:[%s4006_s1 + $0x50] sm:$0xf] }
   0x5   :  { %v2915_v15 = vld [vmem:[%s4006_s1 + $0x164] sm:$0xf0]  ;;  %695 = vmatpush.bf16.msra.mxu1 %v2509_v7  ;;  %v2501_v16 = vor.u32 %v2899_v13, %v2500_v11  ;;  %v2881_v19 = vld [vmem:[%s4006_s1 + $0x54] sm:$0xf0]  ;;  %v2492_v20 = vld [vmem:[%s4006_s1 + $0xd0] sm:$0xf] }
   0x6   :  { %724 = vmatpush.bf16.msra.mxu2 %v2573_v8  ;;  %v2565_v17 = vor.u32 %v2915_v15, %v2564_v14  ;;  %v2897_v21 = vld [vmem:[%s4006_s1 + $0xd4] sm:$0xf0]  ;;  %v2556_v22 = vld [vmem:[%s4006_s1 + $0x150] sm:$0xf]  ;;  %v2429_v24 = vor.u32 %v2881_v19, %v2428_v18  ;;  %v2420_v27 = vld [vmem:[%s4006_s1 + $0x40] sm:$0xf] }
   0x7   :  { %v2913_v23 = vld [vmem:[%s4006_s1 + $0x154] sm:$0xf0]  ;;  %v2493_v25 = vor.u32 %v2897_v21, %v2492_v20  ;;  %v2879_v28 = vld [vmem:[%s4006_s1 + $0x44] sm:$0xf0]  ;;  %v2484_v29 = vld [vmem:[%s4006_s1 + $0xc0] sm:$0xf] }
   0x8   :  { %667 = vmatpush.bf16.msra.mxu0 %v2437_v12  ;;  %3071 = vmatpush.bf16.msra.mxu3 %v2437_v12  ;;  %v2557_v26 = vor.u32 %v2913_v23, %v2556_v22  ;;  %v2895_v30 = vld [vmem:[%s4006_s1 + $0xc4] sm:$0xf0]  ;;  %v2548_v31 = vld [vmem:[%s4006_s1 + $0x140] sm:$0xf]  ;;  %v2421_v33 = vor.u32 %v2879_v28, %v2420_v27  ;;  %v2412_v36 = vld [vmem:[%s4006_s1 + $0x30] sm:$0xf] }
   0x9   :  { %696 = vmatpush.bf16.msra.mxu1 %v2501_v16  ;;  %v2911_v32 = vld [vmem:[%s4006_s1 + $0x144] sm:$0xf0]  ;;  %v2485_v34 = vor.u32 %v2895_v30, %v2484_v29  ;;  %v2877_v37 = vld [vmem:[%s4006_s1 + $0x34] sm:$0xf0]  ;;  %v2476_v38 = vld [vmem:[%s4006_s1 + $0xb0] sm:$0xf] }
   0xa   :  { %725 = vmatpush.bf16.msra.mxu2 %v2565_v17  ;;  %v2549_v35 = vor.u32 %v2911_v32, %v2548_v31  ;;  %v2893_v39 = vld [vmem:[%s4006_s1 + $0xb4] sm:$0xf0]  ;;  %v2540_v40 = vld [vmem:[%s4006_s1 + $0x130] sm:$0xf]  ;;  %v2404_v42 = vld [vmem:[%s4006_s1 + $0x20] sm:$0xf]  ;;  %v2413_v43 = vor.u32 %v2877_v37, %v2412_v36 }
   0xb   :  { %v2909_v41 = vld [vmem:[%s4006_s1 + $0x134] sm:$0xf0]  ;;  %v2875_v44 = vld [vmem:[%s4006_s1 + $0x24] sm:$0xf0]  ;;  %v2468_v45 = vld [vmem:[%s4006_s1 + $0xa0] sm:$0xf]  ;;  %v2477_v47 = vor.u32 %v2893_v39, %v2476_v38 }
   0xc   :  { %668 = vmatpush.bf16.msra.mxu0 %v2429_v24  ;;  %3072 = vmatpush.bf16.msra.mxu3 %v2429_v24  ;;  %v2891_v46 = vld [vmem:[%s4006_s1 + $0xa4] sm:$0xf0]  ;;  %v2541_v48 = vor.u32 %v2909_v41, %v2540_v40  ;;  %v2532_v49 = vld [vmem:[%s4006_s1 + $0x120] sm:$0xf]  ;;  %33 = vst [vmem:[#allocation2] sm:$0xf] %v3098_v50  ;;  %v2405_v55 = vor.u32 %v2875_v44, %v2404_v42 }
   0xd   :  { %697 = vmatpush.bf16.msra.mxu1 %v2493_v25  ;;  %v2866_v51 = vld [vmem:[%s4007_s0] sm:$0xff]  ;;  %v2867_v52 = vld [vmem:[%s4007_s0 + $0x8] sm:$0xff]  ;;  %34 = vst [vmem:[#allocation2 + $0x18] sm:$0xf] %v3098_v50  ;;  %v2868_v54 = vld [vmem:[%s4007_s0 + $0x10] sm:$0xff]  ;;  %v2469_v2 = vor.u32 %v2891_v46, %v2468_v45  ;;  %vm198_vm3 = vcmask 1042432  }
   0xe   :  { %726 = vmatpush.bf16.msra.mxu2 %v2557_v26  ;;  %v2907_v53 = vld [vmem:[%s4006_s1 + $0x124] sm:$0xf0]  ;;  %v2396_v56 = vld [vmem:[%s4006_s1 + $0x10] sm:$0xf]  ;;  %v2873_v57 = vld [vmem:[%s4006_s1 + $0x14] sm:$0xf0] }
   0xf   :  { %v72_v58 = vsel %vm69_vm0, %v2866_v51, 0  ;;  %v74_v59 = vsel %vm69_vm0, %v2867_v52, 0  ;;  %35 = vst [vmem:[#allocation2 + $0x14] sm:$0x1] %v3098_v50  ;;  %v2460_v60 = vld [vmem:[%s4006_s1 + $0x90] sm:$0xf]  ;;  %v2533_v3 = vor.u32 %v2907_v53, %v2532_v49  ;;  %v2397_v16 = vor.u32 %v2873_v57, %v2396_v56 }
  0x10   :  { %669 = vmatpush.bf16.msra.mxu0 %v2421_v33  ;;  %3073 = vmatpush.bf16.msra.mxu3 %v2421_v33  ;;  %v83_v61 = vunpack.c.l.b16 %v72_v58  ;;  %v84_v62 = vunpack.c.h.b16 %v72_v58  ;;  %v85_v63 = vunpack.c.l.b16 %v74_v59  ;;  %v86_v0 = vunpack.c.h.b16 %v74_v59  ;;  %36 = vst [vmem:[#allocation2 + $0x2c] sm:$0x1] %v3098_v50  ;;  %v2869_v1 = vld [vmem:[%s4007_s0 + $0x18] sm:$0xff]  ;;  %v2524_v6 = vld [vmem:[%s4006_s1 + $0x110] sm:$0xf] }
  0x11   :  { %698 = vmatpush.bf16.msra.mxu1 %v2485_v34  ;;  %v2889_v4 = vld [vmem:[%s4006_s1 + $0x94] sm:$0xf0]  ;;  %37 = vst [vmem:[#allocation3] sm:$0xf] %v3098_v50  ;;  %v76_v5 = vsel %vm69_vm0, %v2868_v54, 0  ;;  %v78_v13 = vsel %vm69_vm0, %v2869_v1, 0 }
  0x12   :  { %727 = vmatpush.bf16.msra.mxu2 %v2549_v35  ;;  %v2905_v7 = vld [vmem:[%s4006_s1 + $0x114] sm:$0xf0]  ;;  %v91_v8 = vpack.c.b16 %v83_v61, %v83_v61  ;;  %v92_v9 = vpack.c.b16 %v84_v62, %v84_v62  ;;  %v93_v10 = vpack.c.b16 %v85_v63, %v85_v63  ;;  %38 = vst [vmem:[#allocation3 + $0x18] sm:$0xf] %v3098_v50  ;;  %v2388_v11 = vld [vmem:[%s4006_s1] sm:$0xf]  ;;  %v87_v14 = vunpack.c.l.b16 %v76_v5 }
  0x13   :  { %v94_v12 = vpack.c.b16 %v86_v0, %v86_v0  ;;  %39 = vst [vmem:[#allocation3 + $0x14] sm:$0x1] %v3098_v50  ;;  %v88_v15 = vunpack.c.h.b16 %v76_v5  ;;  %v2871_v17 = vld [vmem:[%s4006_s1 + $0x4] sm:$0xf0]  ;;  %v2452_v18 = vld [vmem:[%s4006_s1 + $0x80] sm:$0xf]  ;;  %v89_v19 = vunpack.c.l.b16 %v78_v13  ;;  %v90_v20 = vunpack.c.h.b16 %v78_v13 }
  0x14   :  { %670 = vmatpush.bf16.msra.mxu0 %v2413_v43  ;;  %3074 = vmatpush.bf16.msra.mxu3 %v2413_v43  ;;  %107 = vst [vmem:[#allocation2 + $0x4] sm:$0xf] %v91_v8  ;;  %v2461_v21 = vor.u32 %v2889_v4, %v2460_v60  ;;  %v2525_v22 = vor.u32 %v2905_v7, %v2524_v6  ;;  %v2887_v23 = vld [vmem:[%s4006_s1 + $0x84] sm:$0xf0]  ;;  %v2516_v24 = vld [vmem:[%s4006_s1 + $0x100] sm:$0xf] }
  0x15   :  { %699 = vmatpush.bf16.msra.mxu1 %v2477_v47  ;;  %108 = vst [vmem:[#allocation2 + $0x8] sm:$0xf] %v92_v9  ;;  %v95_v25 = vpack.c.b16 %v87_v14, %v87_v14  ;;  %v2903_v26 = vld [vmem:[%s4006_s1 + $0x104] sm:$0xf0]  ;;  %v96_v28 = vpack.c.b16 %v88_v15, %v88_v15  ;;  %v115_v29 = vld [vmem:[#allocation2] sm:$0x8]  ;;  %v97_v30 = vpack.c.b16 %v89_v19, %v89_v19 }
  0x16   :  { %728 = vmatpush.bf16.msra.mxu2 %v2541_v48  ;;  %109 = vst [vmem:[#allocation2 + $0xc] sm:$0xf] %v93_v10  ;;  %v125_v27 = vld [vmem:[#allocation2 + $0x14] sm:$0x1]  ;;  %v2389_v31 = vor.u32 %v2871_v17, %v2388_v11  ;;  %v98_v32 = vpack.c.b16 %v90_v20, %v90_v20  ;;  %v2453_v33 = vor.u32 %v2887_v23, %v2452_v18  ;;  %v137_v36 = vunpack.c.l.b16 %v115_v29  ;;  %v120_v8 = vld [vmem:[#allocation2 + $0x18] sm:$0x8] }
  0x17   :  { %110 = vst [vmem:[#allocation2 + $0x10] sm:$0xf] %v94_v12  ;;  %v2517_v34 = vor.u32 %v2903_v26, %v2516_v24  ;;  %v194_v35 = vunpack.c.l.b16 %v125_v27  ;;  %v142_v20 = vunpack.c.l.b16 %v120_v8  ;;  %vm1556_vm4 = vcmask 1044480  }
  0x18   :  { %671 = vmatpush.bf16.msra.mxu0 %v2405_v55  ;;  %3075 = vmatpush.bf16.msra.mxu3 %v2405_v55  ;;  %40 = vst [vmem:[#allocation3 + $0x2c] sm:$0x1] %v3098_v50  ;;  %vm1545_vm5 = vcmask 1041408   ;;  %vm2357_vm6 = vcmask 130048  }
  0x19   :  { %700 = vmatpush.bf16.msra.mxu1 %v2469_v2  ;;  %111 = vst [vmem:[#allocation2 + $0x1c] sm:$0xf] %v95_v25  ;;  %v3317_v40 = vpack.c.b16 %v194_v35, %v194_v35 }
  0x1a   :  { %729 = vmatpush.bf16.msra.mxu2 %v2533_v3  ;;  %112 = vst [vmem:[#allocation2 + $0x20] sm:$0xf] %v96_v28 }
  0x1b   :  { %v116_v37 = vld [vmem:[#allocation2 + $0x4] sm:$0xf]  ;;  %113 = vst [vmem:[#allocation2 + $0x24] sm:$0xf] %v97_v30  ;;  %v202_v55 = vrot.slane %v3317_v40, 5 }
  0x1c   :  { %672 = vmatpush.bf16.msra.mxu0 %v2397_v16  ;;  %3076 = vmatpush.bf16.msra.mxu3 %v2397_v16  ;;  %v138_v38 = vunpack.c.l.b16 %v116_v37  ;;  %114 = vst [vmem:[#allocation2 + $0x28] sm:$0xf] %v98_v32 }
  0x1d   :  { %701 = vmatpush.bf16.msra.mxu1 %v2461_v21  ;;  %v3044_v39 = vld [vmem:[#allocation2 + $0x8] sm:$0xff]  }
  0x1e   :  { %730 = vmatpush.bf16.msra.mxu2 %v2525_v22  ;;  %v2992_v41 = vunpack.c.l.b16 %v3044_v39  ;;  %v2993_v42 = vunpack.c.h.b16 %v3044_v39  ;;  %v147_v43 = vpack.c.b16 %v138_v38, %v137_v36  ;;  %v219_v44 = vshrl.u32 %v3044_v39, 16  ;;  %v119_v45 = vld [vmem:[#allocation2 + $0x10] sm:$0xf] }
  0x1f   :  { %v222_v46 = vshll.u32 %v3044_v39, 16  ;;  %v141_v47 = vunpack.c.l.b16 %v119_v45 }
  0x20   :  { %673 = vmatpush.bf16.msra.mxu0 %v2389_v31  ;;  %3077 = vmatpush.bf16.msra.mxu3 %v2389_v31  ;;  %v153_v48 = vpack.c.b16 %v2992_v41, %v138_v38  ;;  %v211_v49 = vshrl.u32 %v147_v43, 16  ;;  %v214_v50 = vshll.u32 %v147_v43, 16  ;;  %v221_v51 = vrot.slane %v219_v44, 3  ;;  %v121_v25 = vld [vmem:[#allocation2 + $0x1c] sm:$0xf] }
  0x21   :  { %702 = vmatpush.bf16.msra.mxu1 %v2453_v33  ;;  %v224_v52 = vrot.slane %v222_v46, 4  ;;  %v154_v53 = vpack.c.b16 %v141_v47, %v2993_v42  ;;  %v149_v54 = vpack.c.b16 %v141_v47, %v141_v47  ;;  %v143_v38 = vunpack.c.l.b16 %v121_v25 }
  0x22   :  { %731 = vmatpush.bf16.msra.mxu2 %v2517_v34  ;;  %v213_v56 = vrot.slane %v211_v49, 3  ;;  %v216_v57 = vrot.slane %v214_v50, 4  ;;  %v159_v58 = vshrl.u32 %v153_v48, 16  ;;  %v162_v59 = vshll.u32 %v153_v48, 16  ;;  %v3045_v34 = vld [vmem:[#allocation2 + $0x20] sm:$0xff]  }
  0x23   :  { %v3320_v60 = vor.u32 %v224_v52, %v221_v51  ;;  %v167_v61 = vshrl.u32 %v154_v53, 16  ;;  %v170_v62 = vshll.u32 %v154_v53, 16  ;;  %v199_v63 = vrot.slane %v153_v48, 5  ;;  %v124_v47 = vld [vmem:[#allocation2 + $0x28] sm:$0xf] }
  0x24   :  { %v217_v0 = vor.u32 %v216_v57, %v213_v56  ;;  %v161_v1 = vrot.slane %v159_v58, 4  ;;  %v164_v2 = vrot.slane %v162_v59, 5  ;;  %v200_v3 = vrot.slane %v154_v53, 5 }
  0x25   :  { %v169_v4 = vrot.slane %v167_v61, 4  ;;  %v172_v5 = vrot.slane %v170_v62, 5  ;;  %v245_v6 = vshrl.u32 %v199_v63, 16  ;;  %v248_v7 = vshll.u32 %v199_v63, 16 }
  0x26   :  { %v3324_v9 = vsel %vm209_vm1, %v217_v0, %v3320_v60  ;;  %v165_v10 = vor.u32 %v164_v2, %v161_v1  ;;  %v201_v11 = vsel %vm198_vm3, %v199_v63, %v200_v3  ;;  %v262_v12 = vshrl.u32 %v149_v54, 16 }
  0x27   :  { %674 = vmatmul.bf16.vlgmr.msra.gmra.mxu0 %v3324_v9  ;;  %v173_v13 = vor.u32 %v172_v5, %v169_v4  ;;  %v247_v14 = vrot.slane %v245_v6, 3  ;;  %v250_v15 = vrot.slane %v248_v7, 4  ;;  %v253_v16 = vshrl.u32 %v201_v11, 16 }
  0x28   :  { %v228_v17 = vshrl.u32 %v165_v10, 16  ;;  %v231_v18 = vshll.u32 %v165_v10, 16  ;;  %v256_v19 = vshll.u32 %v201_v11, 16  ;;  %v264_v23 = vrot.slane %v262_v12, 3 }
  0x29   :  { %v174_v21 = vsel %vm157_vm2, %v165_v10, %v173_v13  ;;  %v255_v22 = vrot.slane %v253_v16, 3  ;;  %v265_v24 = vshll.u32 %v149_v54, 16  ;;  %v251_v30 = vor.u32 %v250_v15, %v247_v14 }
  0x2a   :  { %v230_v26 = vrot.slane %v228_v17, 3  ;;  %v233_v27 = vrot.slane %v231_v18, 4  ;;  %v236_v28 = vshrl.u32 %v174_v21, 16  ;;  %v239_v29 = vshll.u32 %v174_v21, 16 }
  0x2b   :  { %v258_v31 = vrot.slane %v256_v19, 4  ;;  %v267_v32 = vrot.slane %v265_v24, 4  ;;  %v271_v33 = vshrl.u32 %v173_v13, 16  ;;  %v203_v40 = vsel %vm198_vm3, %v200_v3, %v202_v55 }
  0x2c   :  { %v234_v35 = vor.u32 %v233_v27, %v230_v26  ;;  %v238_v36 = vrot.slane %v236_v28, 3  ;;  %v241_v37 = vrot.slane %v239_v29, 4  ;;  %v2996_v43 = vunpack.c.l.b16 %v3045_v34 }
  0x2d   :  { %v259_v39 = vor.u32 %v258_v31, %v255_v22  ;;  %v268_v42 = vor.u32 %v267_v32, %v264_v23  ;;  %v273_v45 = vrot.slane %v271_v33, 3  ;;  %v274_v46 = vshll.u32 %v173_v13, 16 }
  0x2e   :  { %v242_v41 = vor.u32 %v241_v37, %v238_v36  ;;  %v280_v49 = vshrl.u32 %v203_v40, 16  ;;  %v2997_v50 = vunpack.c.h.b16 %v3045_v34  ;;  %v150_v51 = vpack.c.b16 %v143_v38, %v142_v20 }
  0x2f   :  { %v3331_v44 = vsel %vm209_vm1, %v251_v30, %v259_v39  ;;  %v283_v52 = vshll.u32 %v203_v40, 16  ;;  %v155_v53 = vpack.c.b16 %v2996_v43, %v143_v38  ;;  %v297_v54 = vshrl.u32 %v3045_v34, 16  ;;  %v126_v40 = vld [vmem:[#allocation2 + $0x2c] sm:$0x1] }
  0x30   :  { %v3334_v48 = vsel %vm209_vm1, %v234_v35, %v242_v41  ;;  %732 = vmatmul.bf16.vlgmr.msra.gmra.mxu2 %v3331_v44  ;;  %v300_v55 = vshll.u32 %v3045_v34, 16  ;;  %v3340_v56 = vsel %vm209_vm1, %v3320_v60, %v268_v42  ;;  %v289_v57 = vshrl.u32 %v150_v51, 16 }
  0x31   :  { %703 = vmatmul.bf16.vlgmr.msra.gmra.mxu1 %v3334_v48  ;;  %v292_v58 = vshll.u32 %v150_v51, 16  ;;  %v146_v59 = vunpack.c.l.b16 %v124_v47  ;;  %v299_v61 = vrot.slane %v297_v54, 3  ;;  %v176_v63 = vshrl.u32 %v155_v53, 16 }
  0x32   :  { %v302_v62 = vrot.slane %v300_v55, 4  ;;  %v179_v0 = vshll.u32 %v155_v53, 16  ;;  %v282_v1 = vrot.slane %v280_v49, 3  ;;  %v291_v2 = vrot.slane %v289_v57, 3 }
  0x33   :  { %v294_v3 = vrot.slane %v292_v58, 4  ;;  %v3342_v4 = vpack.c.b16 %v146_v59, %v2997_v50  ;;  %v285_v5 = vrot.slane %v283_v52, 4  ;;  %v178_v7 = vrot.slane %v176_v63, 4  ;;  %v2438_v52 = vld [vmem:[%s4006_s1 + $0x68] sm:$0xf0] }
  0x34   :  { %v3344_v6 = vor.u32 %v302_v62, %v299_v61  ;;  %v181_v8 = vrot.slane %v179_v0, 5  ;;  %v276_v10 = vrot.slane %v274_v46, 4  ;;  %v204_v13 = vrot.slane %v155_v53, 5  ;;  %v2882_v46 = vld [vmem:[%s4006_s1 + $0x64] sm:$0xf] }
  0x35   :  { %v295_v60 = vor.u32 %v294_v3, %v291_v2  ;;  %v184_v11 = vshrl.u32 %v3342_v4, 16  ;;  %v187_v12 = vshll.u32 %v3342_v4, 16  ;;  %v205_v14 = vrot.slane %v3342_v4, 5  ;;  %v2900_v53 = vld [vmem:[%s4006_s1 + $0xf4] sm:$0xf] }
  0x36   :  { %v152_v15 = vpack.c.b16 %v146_v59, %v146_v59  ;;  %v182_v17 = vor.u32 %v181_v8, %v178_v7  ;;  %v286_v20 = vor.u32 %v285_v5, %v282_v1  ;;  %v277_v21 = vor.u32 %v276_v10, %v273_v45  ;;  %v2510_v59 = vld [vmem:[%s4006_s1 + $0xf8] sm:$0xf0]  ;;  %v2898_v63 = vld [vmem:[%s4006_s1 + $0xe4] sm:$0xf]  ;;  %v2502_v0 = vld [vmem:[%s4006_s1 + $0xe8] sm:$0xf0] }
  0x37   :  { %679 = vmatmul.bf16.gmra.mxu0 %v3340_v56  ;;  %v3352_v16 = vsel %vm209_vm1, %v295_v60, %v3344_v6  ;;  %v186_v18 = vrot.slane %v184_v11, 4  ;;  %v189_v19 = vrot.slane %v187_v12, 5  ;;  %v323_v24 = vshrl.u32 %v204_v13, 16  ;;  %v2916_v1 = vld [vmem:[%s4006_s1 + $0x174] sm:$0xf] }
  0x38   :  { %684 = vmatmul.bf16.vlgmr.msra.gmra.mxu3 %v3352_v16  ;;  %v340_v23 = vshrl.u32 %v152_v15, 16  ;;  %v343_v25 = vshll.u32 %v152_v15, 16  ;;  %v306_v27 = vshrl.u32 %v182_v17, 16  ;;  %v206_v28 = vsel %vm198_vm3, %v204_v13, %v205_v14  ;;  %v2880_v2 = vld [vmem:[%s4006_s1 + $0x54] sm:$0xf] }
  0x39   :  { %v3355_v22 = vor.u32 %v189_v19, %v186_v18  ;;  %v326_v29 = vshll.u32 %v204_v13, 16  ;;  %v3363_v30 = vsel %vm209_vm1, %v259_v39, %v286_v20  ;;  %v3366_v31 = vsel %vm209_vm1, %v242_v41, %v277_v21  ;;  %v2884_v39 = vld [vmem:[%s4006_s1 + $0x74] sm:$0xf]  ;;  %v2446_v41 = vld [vmem:[%s4006_s1 + $0x78] sm:$0xf0] }
  0x3a   :  { %v309_v32 = vshll.u32 %v182_v17, 16  ;;  %v342_v33 = vrot.slane %v340_v23, 3  ;;  %v345_v34 = vrot.slane %v343_v25, 4  ;;  %v331_v37 = vshrl.u32 %v206_v28, 16  ;;  %v2430_v3 = vld [vmem:[%s4006_s1 + $0x58] sm:$0xf0] }
  0x3b   :  { %v191_v26 = vsel %vm157_vm2, %v182_v17, %v3355_v22  ;;  %v334_v38 = vshll.u32 %v206_v28, 16  ;;  %v308_v42 = vrot.slane %v306_v27, 3  ;;  %v325_v43 = vrot.slane %v323_v24, 3  ;;  %v2574_v5 = vld [vmem:[%s4006_s1 + $0x178] sm:$0xf0] }
  0x3c   :  { %v314_v35 = vshrl.u32 %v191_v26, 16  ;;  %v317_v36 = vshll.u32 %v191_v26, 16  ;;  %v328_v45 = vrot.slane %v326_v29, 4  ;;  %v311_v47 = vrot.slane %v309_v32, 4  ;;  %v2896_v11 = vld [vmem:[%s4006_s1 + $0xd4] sm:$0xf] }
  0x3d   :  { %v346_v49 = vor.u32 %v345_v34, %v342_v33  ;;  %v195_v50 = vunpack.c.l.b16 %v126_v40  ;;  %v2449_v51 = vor.u32 %v2884_v39, %v2446_v41  ;;  %v333_v57 = vrot.slane %v331_v37, 3  ;;  %v2494_v12 = vld [vmem:[%s4006_s1 + $0xd8] sm:$0xf0]  ;;  %v2914_v13 = vld [vmem:[%s4006_s1 + $0x164] sm:$0xf] }
  0x3e   :  { %v316_v54 = vrot.slane %v314_v35, 3  ;;  %v319_v55 = vrot.slane %v317_v36, 4  ;;  %v336_v58 = vrot.slane %v334_v38, 4  ;;  %v2441_v61 = vor.u32 %v2882_v46, %v2438_v52  ;;  %v2878_v20 = vld [vmem:[%s4006_s1 + $0x44] sm:$0xf] }
  0x3f   :  { %753 = vmatpush.bf16.msrb.mxu3 %v2449_v51  ;;  %v2513_v62 = vor.u32 %v2900_v53, %v2510_v59  ;;  %v3408_v7 = vsel %vm209_vm1, %v3344_v6, %v346_v49  ;;  %v197_v8 = vpack.c.b16 %v195_v50, %v195_v50  ;;  %v2505_v10 = vor.u32 %v2898_v63, %v2502_v0  ;;  %v2566_v6 = vld [vmem:[%s4006_s1 + $0x168] sm:$0xf0]  ;;  %v2894_v27 = vld [vmem:[%s4006_s1 + $0xc4] sm:$0xf]  ;;  %v2912_v29 = vld [vmem:[%s4006_s1 + $0x154] sm:$0xf] }
  0x40   :  { %737 = vmatmul.bf16.gmra.mxu2 %v3363_v30  ;;  %v2577_v60 = vor.u32 %v2916_v1, %v2574_v5  ;;  %v2433_v15 = vor.u32 %v2880_v2, %v2430_v3  ;;  %v2569_v17 = vor.u32 %v2914_v13, %v2566_v6  ;;  %v329_v18 = vor.u32 %v328_v45, %v325_v43  ;;  %v2422_v21 = vld [vmem:[%s4006_s1 + $0x48] sm:$0xf0]  ;;  %v2558_v32 = vld [vmem:[%s4006_s1 + $0x158] sm:$0xf0]  ;;  %v2876_v35 = vld [vmem:[%s4006_s1 + $0x34] sm:$0xf] }
  0x41   :  { %708 = vmatmul.bf16.gmra.mxu1 %v3366_v31  ;;  %782 = vmatpush.bf16.msrb.mxu0 %v2513_v62  ;;  %v3422_v19 = vor.u32 %v336_v58, %v333_v57  ;;  %v312_v23 = vor.u32 %v311_v47, %v308_v42  ;;  %v3431_v24 = vor.u32 %v319_v55, %v316_v54  ;;  %v207_v25 = vrot.slane %v197_v8, 5  ;;  %v2486_v28 = vld [vmem:[%s4006_s1 + $0xc8] sm:$0xf0]  ;;  %v2414_v36 = vld [vmem:[%s4006_s1 + $0x38] sm:$0xf0] }
  0x42   :  { %811 = vmatpush.bf16.msrb.mxu1 %v2577_v60  ;;  %v2497_v26 = vor.u32 %v2896_v11, %v2494_v12  ;;  %v2425_v33 = vor.u32 %v2878_v20, %v2422_v21  ;;  %v2489_v40 = vor.u32 %v2894_v27, %v2486_v28  ;;  %v2561_v42 = vor.u32 %v2912_v29, %v2558_v32  ;;  %v2892_v43 = vld [vmem:[%s4006_s1 + $0xb4] sm:$0xf]  ;;  %v2478_v45 = vld [vmem:[%s4006_s1 + $0xb8] sm:$0xf0]  ;;  %v2910_v39 = vld [vmem:[%s4006_s1 + $0x144] sm:$0xf] }
  0x43   :  { %754 = vmatpush.bf16.msrb.mxu3 %v2441_v61  ;;  %v3447_v34 = vsel %vm209_vm1, %v329_v18, %v3422_v19  ;;  %v3457_v37 = vsel %vm209_vm1, %v312_v23, %v3431_v24  ;;  %v208_v38 = vsel %vm198_vm3, %v205_v14, %v207_v25  ;;  %v2550_v4 = vld [vmem:[%s4006_s1 + $0x148] sm:$0xf0]  ;;  %v2417_v14 = vor.u32 %v2876_v35, %v2414_v36  ;;  %v2874_v47 = vld [vmem:[%s4006_s1 + $0x24] sm:$0xf]  ;;  %v2908_v57 = vld [vmem:[%s4006_s1 + $0x134] sm:$0xf] }
  0x44   :  { %v358_v41 = vshrl.u32 %v208_v38, 16  ;;  %v361_v46 = vshll.u32 %v208_v38, 16  ;;  %v2406_v49 = vld [vmem:[%s4006_s1 + $0x28] sm:$0xf0]  ;;  %v349_v50 = vshrl.u32 %v3355_v22, 16  ;;  %v352_v51 = vshll.u32 %v3355_v22, 16 }
  0x45   :  { %783 = vmatpush.bf16.msrb.mxu0 %v2505_v10  ;;  %v2481_v52 = vor.u32 %v2892_v43, %v2478_v45  ;;  %v2553_v53 = vor.u32 %v2910_v39, %v2550_v4  ;;  %v2890_v54 = vld [vmem:[%s4006_s1 + $0xa4] sm:$0xf]  ;;  %v2470_v55 = vld [vmem:[%s4006_s1 + $0xa8] sm:$0xf0]  ;;  %v2542_v22 = vld [vmem:[%s4006_s1 + $0x138] sm:$0xf0]  ;;  %v2409_v58 = vor.u32 %v2874_v47, %v2406_v49 }
  0x46   :  { %812 = vmatpush.bf16.msrb.mxu1 %v2569_v17  ;;  %v360_v59 = vrot.slane %v358_v41, 3  ;;  %v363_v61 = vrot.slane %v361_v46, 4  ;;  %v2872_v62 = vld [vmem:[%s4006_s1 + $0x14] sm:$0xf]  ;;  %v2398_v63 = vld [vmem:[%s4006_s1 + $0x18] sm:$0xf0]  ;;  %v2473_v2 = vor.u32 %v2890_v54, %v2470_v55  ;;  %v2545_v3 = vor.u32 %v2908_v57, %v2542_v22 }
  0x47   :  { %755 = vmatpush.bf16.msrb.mxu3 %v2433_v15  ;;  %v351_v0 = vrot.slane %v349_v50, 3  ;;  %v354_v1 = vrot.slane %v352_v51, 4  ;;  %v2888_v5 = vld [vmem:[%s4006_s1 + $0x94] sm:$0xf]  ;;  %v2462_v8 = vld [vmem:[%s4006_s1 + $0x98] sm:$0xf0]  ;;  %v2401_v11 = vor.u32 %v2872_v62, %v2398_v63 }
  0x48   :  { %689 = vmatmul.bf16.gmra.mxu3 %v3408_v7  ;;  %v2906_v10 = vld [vmem:[%s4006_s1 + $0x124] sm:$0xf]  ;;  %v2534_v60 = vld [vmem:[%s4006_s1 + $0x128] sm:$0xf0]  ;;  %v364_v12 = vor.u32 %v363_v61, %v360_v59  ;;  %v2465_v17 = vor.u32 %v2888_v5, %v2462_v8  ;;  %v2904_v23 = vld [vmem:[%s4006_s1 + $0x114] sm:$0xf] }
  0x49   :  { %784 = vmatpush.bf16.msrb.mxu0 %v2497_v26  ;;  %v2870_v13 = vld [vmem:[%s4006_s1 + $0x4] sm:$0xf]  ;;  %v2390_v6 = vld [vmem:[%s4006_s1 + $0x8] sm:$0xf0]  ;;  %v355_v15 = vor.u32 %v354_v1, %v351_v0  ;;  %v2537_v18 = vor.u32 %v2906_v10, %v2534_v60  ;;  %v2526_v25 = vld [vmem:[%s4006_s1 + $0x118] sm:$0xf0] }
  0x4a   :  { %813 = vmatpush.bf16.msrb.mxu1 %v2561_v42  ;;  %v2886_v20 = vld [vmem:[%s4006_s1 + $0x84] sm:$0xf]  ;;  %v2454_v21 = vld [vmem:[%s4006_s1 + $0x88] sm:$0xf0]  ;;  %v2393_v26 = vor.u32 %v2870_v13, %v2390_v6  ;;  %v365_v27 = vsel %vm209_vm1, %v3422_v19, %v364_v12  ;;  %v2529_v32 = vor.u32 %v2904_v23, %v2526_v25  ;;  %v2920_v36 = vld [vmem:[%s4008_s3 + $0x10] sm:$0xff] }
  0x4b   :  { %756 = vmatpush.bf16.msrb.mxu3 %v2425_v33  ;;  %v356_v28 = vsel %vm209_vm1, %v3431_v24, %v355_v15  ;;  %v2457_v29 = vor.u32 %v2886_v20, %v2454_v21  ;;  %v2902_v33 = vld [vmem:[%s4006_s1 + $0x104] sm:$0xf]  ;;  %v2518_v35 = vld [vmem:[%s4006_s1 + $0x108] sm:$0xf0]  ;;  %v2925_v24 = vld [vmem:[%s4008_s3 + $0x38] sm:$0xff] }
  0x4c   :  { %v2521_v19 = vor.u32 %v2902_v33, %v2518_v35  ;;  %1338 = vmatpush.bf16.msrb.mxu2 %v2925_v24  ;;  %v2930_v38 = vld [vmem:[%s4008_s3 + $0x60] sm:$0xff]  ;;  %v2919_v42 = vld [vmem:[%s4008_s3 + $0x8] sm:$0xff]  ;;  %v2929_v49 = vld [vmem:[%s4008_s3 + $0x58] sm:$0xff] }
  0x4d   :  { %785 = vmatpush.bf16.msrb.mxu0 %v2489_v40  ;;  %v2939_v40 = vld [vmem:[%s4008_s3 + $0xa8] sm:$0xff]  ;;  %v3597_v45 = vld [vmem:[%s4009_s2] sm:$0x3]  ;;  %v2937_v55 = vld [vmem:[%s4008_s3 + $0x98] sm:$0xff] }
  0x4e   :  { %814 = vmatpush.bf16.msrb.mxu1 %v2553_v53  ;;  %v2918_v39 = vld [vmem:[%s4008_s3] sm:$0xff]  ;;  %v2928_v22 = vld [vmem:[%s4008_s3 + $0x50] sm:$0xff]  ;;  %v2935_v5 = vld [vmem:[%s4008_s3 + $0x88] sm:$0xff] }
  0x4f   :  { %757 = vmatpush.bf16.msrb.mxu3 %v2417_v14  ;;  %v3603_v14 = vperm.slane %v3597_v45, 0  ;;  %v2938_v50 = vld [vmem:[%s4008_s3 + $0xa0] sm:$0xff]  ;;  %v2936_v62 = vld [vmem:[%s4008_s3 + $0x90] sm:$0xff] }
  0x50   :  { %742 = vmatmul.bf16.gmra.mxu2 %v3447_v34  ;;  %v886_v63 = vld [vmem:[#allocation3] sm:$0x8] }
  0x51   :  { %713 = vmatmul.bf16.gmra.mxu1 %v3457_v37  ;;  %786 = vmatpush.bf16.msrb.mxu0 %v2481_v52 }
  0x52   :  { %815 = vmatpush.bf16.msrb.mxu1 %v2545_v3  ;;  %v908_v3 = vunpack.c.l.b16 %v886_v63 }
  0x53   :  { %758 = vmatpush.bf16.msrb.mxu3 %v2409_v58 }
  0x55   :  { %787 = vmatpush.bf16.msrb.mxu0 %v2473_v2  ;;  %v2927_v2 = vld [vmem:[%s4008_s3 + $0x48] sm:$0xff] }
  0x56   :  { %816 = vmatpush.bf16.msrb.mxu1 %v2537_v18 }
  0x57   :  { %759 = vmatpush.bf16.msrb.mxu3 %v2401_v11 }
  0x59   :  { %788 = vmatpush.bf16.msrb.mxu0 %v2465_v17  ;;  %v2934_v17 = vld [vmem:[%s4008_s3 + $0x80] sm:$0xff] }
  0x5a   :  { %817 = vmatpush.bf16.msrb.mxu1 %v2529_v32 }
  0x5b   :  { %760 = vmatpush.bf16.msrb.mxu3 %v2393_v26 }
  0x5d   :  { %789 = vmatpush.bf16.msrb.mxu0 %v2457_v29 }
  0x5e   :  { %761 = vmatmul.bf16.vlgmr.msrb.gmra.mxu3 %v3324_v9  ;;  %818 = vmatpush.bf16.msrb.mxu1 %v2521_v19  ;;  %v2933_v9 = vld [vmem:[%s4008_s3 + $0x78] sm:$0xff] }
  0x5f   :  { %1367 = vmatpush.bf16.msra.mxu3 %v2933_v9 }
  0x60   :  { %747 = vmatmul.bf16.gmra.mxu2 %v365_v27  ;;  %790 = vmatmul.bf16.vlgmr.msrb.gmra.mxu0 %v3334_v48  ;;  %v2923_v48 = vld [vmem:[%s4008_s3 + $0x28] sm:$0xff] }
  0x61   :  { %718 = vmatmul.bf16.gmra.mxu1 %v356_v28 }
  0x6e   :  { %766 = vmatmul.bf16.gmra.mxu3 %v3340_v56  ;;  %v2932_v56 = vld [vmem:[%s4008_s3 + $0x70] sm:$0xff] }
  0x6f   :  { %1368 = vmatpush.bf16.msra.mxu3 %v2932_v56 }
  0x70   :  { %795 = vmatmul.bf16.gmra.mxu0 %v3366_v31  ;;  %v2931_v31 = vld [vmem:[%s4008_s3 + $0x68] sm:$0xff] }
  0x71   :  { %819 = vmatmul.bf16.vlgmr.msrb.gmra.mxu1 %v3331_v44  ;;  %v2924_v44 = vld [vmem:[%s4008_s3 + $0x30] sm:$0xff] }
  0x72   :  { %1339 = vmatpush.bf16.msrb.mxu2 %v2924_v44 }
  0x73   :  { %1369 = vmatpush.bf16.msra.mxu3 %v2931_v31 }
  0x76   :  { %1340 = vmatpush.bf16.msrb.mxu2 %v2923_v48 }
  0x77   :  { %1370 = vmatpush.bf16.msra.mxu3 %v2930_v38 }
  0x7b   :  { %1371 = vmatpush.bf16.msra.mxu3 %v2929_v49 }
  0x7e   :  { %771 = vmatmul.bf16.gmra.mxu3 %v3352_v16  ;;  %v2941_v16 = vld [vmem:[%s4008_s3 + $0xb8] sm:$0xff] }
  0x7f   :  { %1396 = vmatpush.bf16.msra.mxu0 %v2941_v16  ;;  %1372 = vmatpush.bf16.msra.mxu3 %v2928_v22 }
  0x80   :  { %800 = vmatmul.bf16.gmra.mxu0 %v3457_v37 }
  0x81   :  { %824 = vmatmul.bf16.gmra.mxu1 %v3363_v30  ;;  %v2922_v30 = vld [vmem:[%s4008_s3 + $0x20] sm:$0xff] }
  0x82   :  { %1341 = vmatpush.bf16.msrb.mxu2 %v2922_v30 }
  0x83   :  { %1373 = vmatpush.bf16.msra.mxu3 %v2927_v2 }
  0x8e   :  { %776 = vmatmul.bf16.gmra.mxu3 %v3408_v7  ;;  %v2940_v7 = vld [vmem:[%s4008_s3 + $0xb0] sm:$0xff] }
  0x8f   :  { %1397 = vmatpush.bf16.msra.mxu0 %v2940_v7 }
  0x90   :  { %805 = vmatmul.bf16.gmra.mxu0 %v356_v28  ;;  %v2926_v28 = vld [vmem:[%s4008_s3 + $0x40] sm:$0xff] }
  0x91   :  { %829 = vmatmul.bf16.gmra.mxu1 %v3447_v34  ;;  %v2921_v34 = vld [vmem:[%s4008_s3 + $0x18] sm:$0xff]  ;;  %1374 = vmatpush.bf16.msra.mxu3 %v2926_v28 }
  0x92   :  { %1342 = vmatpush.bf16.msrb.mxu2 %v2921_v34 }
  0x93   :  { %1398 = vmatpush.bf16.msra.mxu0 %v2939_v40 }
  0x96   :  { %1343 = vmatpush.bf16.msrb.mxu2 %v2920_v36 }
  0x97   :  { %1399 = vmatpush.bf16.msra.mxu0 %v2938_v50 }
  0x9a   :  { %1344 = vmatpush.bf16.msrb.mxu2 %v2919_v42 }
  0x9b   :  { %1400 = vmatpush.bf16.msra.mxu0 %v2937_v55 }
  0x9e   :  { %1345 = vmatpush.bf16.msrb.mxu2 %v2918_v39 }
  0x9f   :  { %1401 = vmatpush.bf16.msra.mxu0 %v2936_v62  ;;  %v891_v62 = vld [vmem:[#allocation3 + $0x18] sm:$0x8] }
  0xa1   :  { %834 = vmatmul.bf16.gmra.mxu1 %v365_v27 }
  0xa3   :  { %1402 = vmatpush.bf16.msra.mxu0 %v2935_v5 }
  0xa4   :  { %v675_v37 = vpop.f32.mrf.mxu0 }
  0xa7   :  { %1403 = vmatpush.bf16.msra.mxu0 %v2934_v17 }
  0xac   :  { %v677_v46 = vpop.f32.mrf.mxu0 }
  0xae   :  { %v704_v43 = vpop.f32.mrf.mxu1 }
  0xaf   :  { %v705_v4 = vadd.f32 %v704_v43, %v675_v37 }
  0xb3   :  { %v733_v41 = vpop.f32.mrf.mxu2 }
  0xb4   :  { %v734_v47 = vadd.f32 %v733_v41, %v705_v4  ;;  %v680_v58 = vpop.f32.mrf.mxu0 }
  0xb6   :  { %v846_v51 = vadd.f32 %v3603_v14, %v734_v47  ;;  %v706_v52 = vpop.f32.mrf.mxu1 }
  0xb7   :  { %v707_v59 = vadd.f32 %v706_v52, %v677_v46 }
  0xb8   :  { %v862_v53 = vmax.f32 %v846_v51, 0.0  ;;  %v896_v51 = vld [vmem:[#allocation3 + $0x14] sm:$0x1] }
  0xba   :  { %v870_v54 = vpack.c.bf16 %v862_v53, %v862_v53 }
  0xbb   :  { %v735_v57 = vpop.f32.mrf.mxu2  ;;  %v685_v29 = vpop.f32.mrf.mxu3 }
  0xbc   :  { %878 = vst [vmem:[#allocation3 + $0x4] sm:$0xf] %v870_v54  ;;  %v736_v0 = vadd.f32 %v735_v57, %v707_v59  ;;  %v682_v18 = vpop.f32.mrf.mxu0 }
  0xbe   :  { %v709_v61 = vpop.f32.mrf.mxu1  ;;  %v848_v60 = vadd.f32 %v3603_v14, %v736_v0 }
  0xbf   :  { %v710_v1 = vadd.f32 %v709_v61, %v680_v58  ;;  %v964_v58 = vunpack.c.l.b16 %v896_v51 }
  0xc0   :  { %v863_v20 = vmax.f32 %v848_v60, 0.0 }
  0xc3   :  { %v738_v8 = vpop.f32.mrf.mxu2  ;;  %v887_v10 = vld [vmem:[#allocation3 + $0x4] sm:$0xf]  ;;  %v687_v39 = vpop.f32.mrf.mxu3 }
  0xc4   :  { %v739_v11 = vadd.f32 %v738_v8, %v710_v1  ;;  %v909_v12 = vunpack.c.l.b16 %v887_v10 }
  0xc6   :  { %v850_v13 = vadd.f32 %v3603_v14, %v739_v11  ;;  %v711_v6 = vpop.f32.mrf.mxu1  ;;  %v918_v15 = vpack.c.b16 %v909_v12, %v908_v3  ;;  %v966_v11 = vpack.c.b16 %v964_v58, %v964_v58 }
  0xc7   :  { %v712_v27 = vadd.f32 %v711_v6, %v682_v18 }
  0xc8   :  { %v864_v21 = vmax.f32 %v850_v13, 0.0  ;;  %v979_v23 = vshrl.u32 %v918_v15, 16  ;;  %v982_v25 = vshll.u32 %v918_v15, 16 }
  0xca   :  { %v3001_v26 = vpack.c.bf16 %v864_v21, %v863_v20  ;;  %v981_v35 = vrot.slane %v979_v23, 3  ;;  %v984_v24 = vrot.slane %v982_v25, 4 }
  0xcb   :  { %v740_v32 = vpop.f32.mrf.mxu2  ;;  %v690_v8 = vpop.f32.mrf.mxu3 }
  0xcc   :  { %v741_v33 = vadd.f32 %v740_v32, %v712_v27  ;;  %v3010_v19 = vunpack.c.l.b16 %v3001_v26  ;;  %v987_v9 = vshrl.u32 %v3001_v26, 16  ;;  %v990_v44 = vshll.u32 %v3001_v26, 16 }
  0xcd   :  { %v985_v36 = vor.u32 %v984_v24, %v981_v35  ;;  %v3011_v59 = vunpack.c.h.b16 %v3001_v26 }
  0xce   :  { %v852_v48 = vadd.f32 %v3603_v14, %v741_v33  ;;  %v714_v56 = vpop.f32.mrf.mxu1  ;;  %v989_v16 = vrot.slane %v987_v9, 3  ;;  %v992_v30 = vrot.slane %v990_v44, 4  ;;  %v924_v34 = vpack.c.b16 %v3010_v19, %v909_v12 }
  0xcf   :  { %v715_v7 = vadd.f32 %v714_v56, %v685_v29  ;;  %v913_v12 = vunpack.c.l.b16 %v891_v62  ;;  %v971_v56 = vrot.slane %v966_v11, 5 }
  0xd0   :  { %v865_v31 = vmax.f32 %v852_v48, 0.0  ;;  %v3636_v37 = vor.u32 %v992_v30, %v989_v16  ;;  %v929_v4 = vshrl.u32 %v924_v34, 16  ;;  %v932_v41 = vshll.u32 %v924_v34, 16 }
  0xd1   :  { %v968_v49 = vrot.slane %v924_v34, 5 }
  0xd2   :  { %v873_v38 = vpack.c.bf16 %v865_v31, %v865_v31  ;;  %v994_v42 = vsel %vm209_vm1, %v985_v36, %v3636_v37  ;;  %v931_v52 = vrot.slane %v929_v4, 4  ;;  %v934_v53 = vrot.slane %v932_v41, 5 }
  0xd3   :  { %v743_v40 = vpop.f32.mrf.mxu2  ;;  %1346 = vmatmul.bf16.vlgmr.msrb.gmra.mxu2 %v994_v42  ;;  %v1013_v22 = vshrl.u32 %v968_v49, 16  ;;  %v1016_v0 = vshll.u32 %v968_v49, 16  ;;  %v692_v51 = vpop.f32.mrf.mxu3 }
  0xd4   :  { %881 = vst [vmem:[#allocation3 + $0x10] sm:$0xf] %v873_v38  ;;  %v744_v43 = vadd.f32 %v743_v40, %v715_v7  ;;  %v935_v1 = vor.u32 %v934_v53, %v931_v52 }
  0xd5   :  { %v1015_v60 = vrot.slane %v1013_v22, 3  ;;  %v1018_v18 = vrot.slane %v1016_v0, 4 }
  0xd6   :  { %v854_v46 = vadd.f32 %v3603_v14, %v744_v43  ;;  %v716_v47 = vpop.f32.mrf.mxu1  ;;  %v996_v23 = vshrl.u32 %v935_v1, 16  ;;  %v999_v28 = vshll.u32 %v935_v1, 16 }
  0xd7   :  { %v717_v63 = vadd.f32 %v716_v47, %v687_v39  ;;  %v1019_v36 = vor.u32 %v1018_v18, %v1015_v60 }
  0xd8   :  { %v866_v50 = vmax.f32 %v854_v46, 0.0  ;;  %v998_v40 = vrot.slane %v996_v23, 3  ;;  %v1001_v4 = vrot.slane %v999_v28, 4 }
  0xda   :  { %v874_v54 = vpack.c.bf16 %v866_v50, %v866_v50  ;;  %v1002_v58 = vor.u32 %v1001_v4, %v998_v40 }
  0xdb   :  { %v745_v55 = vpop.f32.mrf.mxu2  ;;  %v890_v57 = vld [vmem:[#allocation3 + $0x10] sm:$0xf] }
  0xdc   :  { %882 = vst [vmem:[#allocation3 + $0x1c] sm:$0xf] %v874_v54  ;;  %v912_v61 = vunpack.c.l.b16 %v890_v57  ;;  %v746_v10 = vadd.f32 %v745_v55, %v717_v63 }
  0xde   :  { %v719_v2 = vpop.f32.mrf.mxu1  ;;  %v925_v3 = vpack.c.b16 %v912_v61, %v3011_v59  ;;  %v920_v5 = vpack.c.b16 %v912_v61, %v912_v61  ;;  %v856_v9 = vadd.f32 %v3603_v14, %v746_v10 }
  0xdf   :  { %v720_v13 = vadd.f32 %v719_v2, %v690_v8 }
  0xe0   :  { %v969_v6 = vrot.slane %v925_v3, 5  ;;  %v1030_v15 = vshrl.u32 %v920_v5, 16  ;;  %v1033_v17 = vshll.u32 %v920_v5, 16  ;;  %v937_v20 = vshrl.u32 %v925_v3, 16 }
  0xe1   :  { %v940_v21 = vshll.u32 %v925_v3, 16  ;;  %v867_v46 = vmax.f32 %v856_v9, 0.0  ;;  %v897_v9 = vld [vmem:[#allocation3 + $0x2c] sm:$0x1] }
  0xe2   :  { %v970_v25 = vsel %vm198_vm3, %v968_v49, %v969_v6  ;;  %v1032_v26 = vrot.slane %v1030_v15, 3  ;;  %v1035_v27 = vrot.slane %v1033_v17, 4  ;;  %v939_v35 = vrot.slane %v937_v20, 4 }
  0xe3   :  { %v748_v29 = vpop.f32.mrf.mxu2  ;;  %v1021_v32 = vshrl.u32 %v970_v25, 16  ;;  %v1024_v33 = vshll.u32 %v970_v25, 16  ;;  %v942_v19 = vrot.slane %v940_v21, 5  ;;  %v892_v24 = vld [vmem:[#allocation3 + $0x1c] sm:$0xf]  ;;  %v972_v53 = vsel %vm198_vm3, %v969_v6, %v971_v56 }
  0xe4   :  { %v749_v44 = vadd.f32 %v748_v29, %v720_v13  ;;  %v1036_v48 = vor.u32 %v1035_v27, %v1032_v26  ;;  %v914_v7 = vunpack.c.l.b16 %v892_v24  ;;  %v1051_v2 = vshll.u32 %v972_v53, 16 }
  0xe5   :  { %v1023_v16 = vrot.slane %v1021_v32, 3  ;;  %v1026_v30 = vrot.slane %v1024_v33, 4  ;;  %v943_v31 = vor.u32 %v942_v19, %v939_v35 }
  0xe6   :  { %v858_v34 = vadd.f32 %v3603_v14, %v749_v44  ;;  %v1037_v38 = vsel %vm209_vm1, %v3636_v37, %v1036_v48  ;;  %v721_v42 = vpop.f32.mrf.mxu1  ;;  %v921_v41 = vpack.c.b16 %v914_v7, %v913_v12  ;;  %v1053_v17 = vrot.slane %v1051_v2, 4 }
  0xe7   :  { %v1027_v43 = vor.u32 %v1026_v30, %v1023_v16  ;;  %1351 = vmatmul.bf16.gmra.mxu2 %v1037_v38  ;;  %v944_v39 = vsel %vm157_vm2, %v935_v1, %v943_v31  ;;  %v722_v55 = vadd.f32 %v721_v42, %v692_v51  ;;  %v1048_v1 = vshrl.u32 %v972_v53, 16 }
  0xe8   :  { %v868_v47 = vmax.f32 %v858_v34, 0.0  ;;  %v1004_v49 = vshrl.u32 %v944_v39, 16  ;;  %v1007_v50 = vshll.u32 %v944_v39, 16  ;;  %v1057_v59 = vshrl.u32 %v921_v41, 16  ;;  %v791_v39 = vpop.f32.mrf.mxu0 }
  0xe9   :  { %v1028_v52 = vsel %vm209_vm1, %v1019_v36, %v1027_v43  ;;  %v1060_v63 = vshll.u32 %v921_v41, 16  ;;  %v1050_v15 = vrot.slane %v1048_v1, 3  ;;  %v1039_v21 = vshrl.u32 %v943_v31, 16 }
  0xea   :  { %v3006_v54 = vpack.c.bf16 %v868_v47, %v867_v46  ;;  %1404 = vmatmul.bf16.vlgmr.msra.gmra.mxu0 %v1028_v52  ;;  %v1006_v37 = vrot.slane %v1004_v49, 3  ;;  %v1009_v57 = vrot.slane %v1007_v50, 4  ;;  %v1059_v13 = vrot.slane %v1057_v59, 3 }
  0xeb   :  { %v750_v22 = vpop.f32.mrf.mxu2  ;;  %v1062_v6 = vrot.slane %v1060_v63, 4  ;;  %v1042_v23 = vshll.u32 %v943_v31, 16  ;;  %v1054_v27 = vor.u32 %v1053_v17, %v1050_v15  ;;  %v1041_v28 = vrot.slane %v1039_v21, 3 }
  0xec   :  { %v751_v61 = vadd.f32 %v750_v22, %v722_v55  ;;  %v1010_v62 = vor.u32 %v1009_v57, %v1006_v37  ;;  %v1065_v0 = vshrl.u32 %v3006_v54, 16  ;;  %v1068_v3 = vshll.u32 %v3006_v54, 16 }
  0xed   :  { %v3014_v60 = vunpack.c.l.b16 %v3006_v54  ;;  %v1063_v26 = vor.u32 %v1062_v6, %v1059_v13  ;;  %v1044_v29 = vrot.slane %v1042_v23, 4  ;;  %v1055_v35 = vsel %vm209_vm1, %v1027_v43, %v1054_v27  ;;  %v762_v43 = vpop.f32.mrf.mxu3 }
  0xee   :  { %v860_v5 = vadd.f32 %v3603_v14, %v751_v61  ;;  %v1011_v8 = vsel %vm209_vm1, %v1002_v58, %v1010_v62  ;;  %v1067_v10 = vrot.slane %v1065_v0, 3  ;;  %v1070_v11 = vrot.slane %v1068_v3, 4 }
  0xef   :  { %1375 = vmatmul.bf16.vlgmr.msra.gmra.mxu3 %v1011_v8  ;;  %v926_v25 = vpack.c.b16 %v3014_v60, %v914_v7  ;;  %v1045_v24 = vor.u32 %v1044_v29, %v1041_v28  ;;  %v3015_v16 = vunpack.c.h.b16 %v3006_v54  ;;  %v965_v7 = vunpack.c.l.b16 %v897_v9 }
  0xf0   :  { %v869_v12 = vmax.f32 %v860_v5, 0.0  ;;  %v1071_v20 = vor.u32 %v1070_v11, %v1067_v10  ;;  %v3654_v52 = vadd.f32 %v791_v39, %v762_v43  ;;  %v3659_v11 = vpop.f32.mrf.mxu0 }
  0xf1   :  { %v946_v32 = vshrl.u32 %v926_v25, 16  ;;  %v949_v33 = vshll.u32 %v926_v25, 16  ;;  %v973_v19 = vrot.slane %v926_v25, 5  ;;  %v1046_v34 = vsel %vm209_vm1, %v1010_v62, %v1045_v24 }
  0xf2   :  { %v877_v18 = vpack.c.bf16 %v869_v12, %v869_v12  ;;  %v1072_v14 = vsel %vm209_vm1, %v1063_v26, %v1071_v20  ;;  %v967_v51 = vpack.c.b16 %v965_v7, %v965_v7 }
  0xf3   :  { %v948_v48 = vrot.slane %v946_v32, 4  ;;  %v951_v56 = vrot.slane %v949_v33, 5  ;;  %v1091_v31 = vshrl.u32 %v973_v19, 16  ;;  %v1094_v40 = vshll.u32 %v973_v19, 16 }
  0xf4   :  { %885 = vst [vmem:[#allocation3 + $0x28] sm:$0xf] %v877_v18  ;;  %v976_v5 = vrot.slane %v967_v51, 5 }
  0xf5   :  { %v952_v42 = vor.u32 %v951_v56, %v948_v48  ;;  %v1093_v49 = vrot.slane %v1091_v31, 3  ;;  %v1096_v57 = vrot.slane %v1094_v40, 4  ;;  %v3661_v12 = vpop.f32.mrf.mxu3 }
  0xf7   :  { %1356 = vmatmul.bf16.gmra.mxu2 %v1072_v14  ;;  %v1074_v62 = vshrl.u32 %v952_v42, 16  ;;  %v1077_v63 = vshll.u32 %v952_v42, 16  ;;  %v1097_v8 = vor.u32 %v1096_v57, %v1093_v49  ;;  %v2964_v57 = vld [vmem:[%s4011_s5 + $0xb0] sm:$0xff] }
  0xf8   :  { %v796_v29 = vpop.f32.mrf.mxu0 }
  0xf9   :  { %v1076_v13 = vrot.slane %v1074_v62, 3  ;;  %v1079_v6 = vrot.slane %v1077_v63, 4  ;;  %v2947_v62 = vld [vmem:[%s4011_s5 + $0x28] sm:$0xff] }
  0xfa   :  { %1409 = vmatmul.bf16.gmra.mxu0 %v1055_v35 }
  0xfb   :  { %v895_v44 = vld [vmem:[#allocation3 + $0x28] sm:$0xf]  ;;  %v1080_v25 = vor.u32 %v1079_v6, %v1076_v13  ;;  %v3719_v6 = vld [vmem:[%s4010_s4] ss:$0 sm:$0xff] }
  0xfc   :  { %v917_v30 = vunpack.c.l.b16 %v895_v44 }
  0xfd   :  { %v767_v32 = vpop.f32.mrf.mxu3 }
  0xfe   :  { %v927_v36 = vpack.c.b16 %v917_v30, %v3015_v16  ;;  %v923_v38 = vpack.c.b16 %v917_v30, %v917_v30  ;;  %v3666_v33 = vadd.f32 %v796_v29, %v767_v32 }
  0xff   :  { %1380 = vmatmul.bf16.gmra.mxu3 %v1046_v34 }
 0x100   :  { %v974_v4 = vrot.slane %v927_v36, 5  ;;  %v1108_v41 = vshrl.u32 %v923_v38, 16  ;;  %v1111_v46 = vshll.u32 %v923_v38, 16  ;;  %v954_v47 = vshrl.u32 %v927_v36, 16  ;;  %v798_v16 = vpop.f32.mrf.mxu0 }
 0x101   :  { %v957_v50 = vshll.u32 %v927_v36, 16 }
 0x102   :  { %v975_v53 = vsel %vm198_vm3, %v973_v19, %v974_v4  ;;  %v1110_v54 = vrot.slane %v1108_v41, 3  ;;  %v1113_v55 = vrot.slane %v1111_v46, 4  ;;  %v956_v37 = vrot.slane %v954_v47, 4 }
 0x103   :  { %v1099_v22 = vshrl.u32 %v975_v53, 16  ;;  %v1102_v58 = vshll.u32 %v975_v53, 16  ;;  %v959_v59 = vrot.slane %v957_v50, 5  ;;  %v2957_v53 = vld [vmem:[%s4011_s5 + $0x78] sm:$0xff] }
 0x104   :  { %v1114_v61 = vor.u32 %v1113_v55, %v1110_v54  ;;  %v2965_v54 = vld [vmem:[%s4011_s5 + $0xb8] sm:$0xff]  ;;  %1820 = vmatpush.bf16.msra.mxu2 %v2957_v53 }
 0x105   :  { %v1101_v0 = vrot.slane %v1099_v22, 3  ;;  %v1104_v1 = vrot.slane %v1102_v58, 4  ;;  %v960_v2 = vor.u32 %v959_v59, %v956_v37  ;;  %v769_v30 = vpop.f32.mrf.mxu3  ;;  %1849 = vmatpush.bf16.msrb.mxu3 %v2965_v54  ;;  %v2949_v55 = vld [vmem:[%s4011_s5 + $0x38] sm:$0xff]  ;;  %v2956_v37 = vld [vmem:[%s4011_s5 + $0x70] sm:$0xff]  ;;  %v820_v58 = vpop.f32.mrf.mxu1  ;;  %v2955_v59 = vld [vmem:[%s4011_s5 + $0x68] sm:$0xff] }
 0x106   :  { %v1115_v3 = vsel %vm209_vm1, %v1071_v20, %v1114_v61  ;;  %v977_v20 = vsel %vm198_vm3, %v974_v4, %v976_v5  ;;  %v3668_v31 = vadd.f32 %v798_v16, %v769_v30  ;;  %1791 = vmatpush.bf16.msra.mxu1 %v2949_v55  ;;  %v2948_v22 = vld [vmem:[%s4011_s5 + $0x30] sm:$0xff]  ;;  %v2963_v61 = vld [vmem:[%s4011_s5 + $0xa8] sm:$0xff] }
 0x107   :  { %v1105_v10 = vor.u32 %v1104_v1, %v1101_v0  ;;  %1361 = vmatmul.bf16.gmra.mxu2 %v1115_v3  ;;  %v961_v60 = vsel %vm157_vm2, %v952_v42, %v960_v2  ;;  %v1126_v27 = vshrl.u32 %v977_v20, 16  ;;  %v1129_v14 = vshll.u32 %v977_v20, 16 }
 0x108   :  { %v1082_v15 = vshrl.u32 %v961_v60, 16  ;;  %v1085_v17 = vshll.u32 %v961_v60, 16  ;;  %v1117_v24 = vshrl.u32 %v960_v2, 16  ;;  %v1120_v9 = vshll.u32 %v960_v2, 16  ;;  %v801_v38 = vpop.f32.mrf.mxu0  ;;  %1821 = vmatpush.bf16.msra.mxu2 %v2956_v37  ;;  %v2946_v2 = vld [vmem:[%s4011_s5 + $0x20] sm:$0xff] }
 0x109   :  { %v1106_v18 = vsel %vm209_vm1, %v1097_v8, %v1105_v10  ;;  %v1128_v35 = vrot.slane %v1126_v27, 3  ;;  %v1131_v19 = vrot.slane %v1129_v14, 4  ;;  %1850 = vmatpush.bf16.msrb.mxu3 %v2964_v57  ;;  %v2954_v8 = vld [vmem:[%s4011_s5 + $0x60] sm:$0xff] }
 0x10a   :  { %1414 = vmatmul.bf16.gmra.mxu0 %v1106_v18  ;;  %v1084_v21 = vrot.slane %v1082_v15, 3  ;;  %v1087_v23 = vrot.slane %v1085_v17, 4  ;;  %v1119_v48 = vrot.slane %v1117_v24, 3  ;;  %v1122_v56 = vrot.slane %v1120_v9, 4  ;;  %1792 = vmatpush.bf16.msra.mxu1 %v2948_v22  ;;  %v2945_v15 = vld [vmem:[%s4011_s5 + $0x18] sm:$0xff]  ;;  %v2950_v57 = vld [vmem:[%s4011_s5 + $0x40] sm:$0xff] }
 0x10b   :  { %v1132_v44 = vor.u32 %v1131_v19, %v1128_v35  ;;  %v821_v17 = vadd.f32 %v820_v58, %v3654_v52  ;;  %v3726_v18 = vperm.slane %v3597_v45, 1  ;;  %v2953_v52 = vld [vmem:[%s4011_s5 + $0x58] sm:$0xff]  ;;  %v2943_v19 = vld [vmem:[%s4011_s5 + $0x8] sm:$0xff]  ;;  %v2958_v22 = vld [vmem:[%s4011_s5 + $0x80] sm:$0xff] }
 0x10c   :  { %v1088_v26 = vor.u32 %v1087_v23, %v1084_v21  ;;  %v1123_v34 = vor.u32 %v1122_v56, %v1119_v48  ;;  %1822 = vmatpush.bf16.msra.mxu2 %v2955_v59  ;;  %v2961_v45 = vld [vmem:[%s4011_s5 + $0x98] sm:$0xff]  ;;  %v2942_v56 = vld [vmem:[%s4011_s5] sm:$0xff] }
 0x10d   :  { %v1133_v7 = vsel %vm209_vm1, %v1105_v10, %v1132_v44  ;;  %v772_v40 = vpop.f32.mrf.mxu3  ;;  %1851 = vmatpush.bf16.msrb.mxu3 %v2963_v61  ;;  %v822_v1 = vpop.f32.mrf.mxu1  ;;  %v2962_v10 = vld [vmem:[%s4011_s5 + $0xa0] sm:$0xff]  ;;  %v847_v27 = vadd.f32 %v3726_v18, %v821_v17  ;;  %v794_v44 = vadd.f32 %v3659_v11, %v3661_v12 }
 0x10e   :  { %v1089_v28 = vsel %vm209_vm1, %v1080_v25, %v1088_v26  ;;  %v1124_v36 = vsel %vm209_vm1, %v1088_v26, %v1123_v34  ;;  %v3672_v42 = vadd.f32 %v801_v38, %v772_v40  ;;  %1793 = vmatpush.bf16.msra.mxu1 %v2947_v62  ;;  %v2944_v25 = vld [vmem:[%s4011_s5 + $0x10] sm:$0xff] }
 0x10f   :  { %1385 = vmatmul.bf16.gmra.mxu3 %v1089_v28  ;;  %v2960_v34 = vld [vmem:[%s4011_s5 + $0x90] sm:$0xff]  ;;  %v823_v12 = vadd.f32 %v822_v1, %v794_v44 }
 0x110   :  { %v803_v39 = vpop.f32.mrf.mxu0  ;;  %1823 = vmatpush.bf16.msra.mxu2 %v2954_v8 }
 0x111   :  { %1852 = vmatpush.bf16.msrb.mxu3 %v2962_v10 }
 0x112   :  { %1794 = vmatpush.bf16.msra.mxu1 %v2946_v2 }
 0x114   :  { %1824 = vmatpush.bf16.msra.mxu2 %v2953_v52 }
 0x115   :  { %v774_v43 = vpop.f32.mrf.mxu3  ;;  %v825_v23 = vpop.f32.mrf.mxu1  ;;  %1853 = vmatpush.bf16.msrb.mxu3 %v2961_v45 }
 0x116   :  { %v3674_v4 = vadd.f32 %v803_v39, %v774_v43  ;;  %1795 = vmatpush.bf16.msra.mxu1 %v2945_v15  ;;  %v826_v39 = vadd.f32 %v825_v23, %v3666_v33  ;;  %v1477_v15 = vld [vmem:[#allocation2] sm:$0x8] }
 0x118   :  { %v806_v41 = vpop.f32.mrf.mxu0  ;;  %v851_v54 = vadd.f32 %v3726_v18, %v826_v39 }
 0x119   :  { %1854 = vmatpush.bf16.msrb.mxu3 %v2960_v34 }
 0x11a   :  { %1419 = vmatmul.bf16.gmra.mxu0 %v1133_v7  ;;  %1796 = vmatpush.bf16.msra.mxu1 %v2944_v25  ;;  %v2952_v7 = vld [vmem:[%s4011_s5 + $0x50] sm:$0xff] }
 0x11b   :  { %1825 = vmatpush.bf16.msra.mxu2 %v2952_v7 }
 0x11d   :  { %v777_v46 = vpop.f32.mrf.mxu3  ;;  %v827_v16 = vpop.f32.mrf.mxu1 }
 0x11e   :  { %v3676_v47 = vadd.f32 %v806_v41, %v777_v46  ;;  %1797 = vmatpush.bf16.msra.mxu1 %v2943_v19  ;;  %v2951_v46 = vld [vmem:[%s4011_s5 + $0x48] sm:$0xff] }
 0x11f   :  { %1390 = vmatmul.bf16.gmra.mxu3 %v1124_v36  ;;  %1826 = vmatpush.bf16.msra.mxu2 %v2951_v46 }
 0x120   :  { %v808_v49 = vpop.f32.mrf.mxu0 }
 0x122   :  { %1798 = vmatpush.bf16.msra.mxu1 %v2942_v56 }
 0x123   :  { %1827 = vmatpush.bf16.msra.mxu2 %v2950_v57 }
 0x125   :  { %v779_v50 = vpop.f32.mrf.mxu3  ;;  %v830_v58 = vpop.f32.mrf.mxu1 }
 0x126   :  { %v3678_v51 = vadd.f32 %v808_v49, %v779_v50  ;;  %v2959_v49 = vld [vmem:[%s4011_s5 + $0x88] sm:$0xff]  ;;  %v849_v50 = vadd.f32 %v3726_v18, %v823_v12 }
 0x127   :  { %1855 = vmatpush.bf16.msrb.mxu3 %v2959_v49 }
 0x12b   :  { %1856 = vmatpush.bf16.msrb.mxu3 %v2958_v22 }
 0x156   :  { %v1347_v63 = vpop.f32.mrf.mxu2 }
 0x15e   :  { %v1349_v3 = vpop.f32.mrf.mxu2 }
 0x167   :  { %v1405_v0 = vpop.f32.mrf.mxu0 }
 0x16a   :  { %v1352_v26 = vpop.f32.mrf.mxu2 }
 0x16f   :  { %v1407_v5 = vpop.f32.mrf.mxu0 }
 0x172   :  { %v1376_v60 = vpop.f32.mrf.mxu3  ;;  %v1354_v36 = vpop.f32.mrf.mxu2 }
 0x173   :  { %v1377_v13 = vadd.f32 %v1376_v60, %v1347_v63  ;;  %v828_v63 = vadd.f32 %v827_v16, %v3668_v31  ;;  %v832_v31 = vpop.f32.mrf.mxu1 }
 0x175   :  { %v1406_v21 = vadd.f32 %v1405_v0, %v1377_v13  ;;  %v853_v10 = vadd.f32 %v3726_v18, %v828_v63 }
 0x177   :  { %v1429_v20 = vadd.f32 %v3719_v6, %v1406_v21  ;;  %v1410_v28 = vpop.f32.mrf.mxu0 }
 0x179   :  { %v1437_v14 = vmax.f32 %v1429_v20, 0.0  ;;  %v831_v20 = vadd.f32 %v830_v58, %v3672_v42 }
 0x17a   :  { %v1378_v29 = vpop.f32.mrf.mxu3  ;;  %v1357_v62 = vpop.f32.mrf.mxu2 }
 0x17b   :  { %v1445_v32 = vadd.f32 %v1437_v14, %v847_v27  ;;  %v1379_v35 = vadd.f32 %v1378_v29, %v1349_v3  ;;  %v1503_v27 = vunpack.c.l.b16 %v1477_v15  ;;  %v855_v29 = vadd.f32 %v3726_v18, %v831_v20 }
 0x17d   :  { %v1453_v24 = vmax.f32 %v1445_v32, 0.0  ;;  %v1408_v9 = vadd.f32 %v1407_v5, %v1379_v35 }
 0x17f   :  { %v1461_v48 = vpack.c.bf16 %v1453_v24, %v1453_v24  ;;  %v1430_v30 = vadd.f32 %v3719_v6, %v1408_v9  ;;  %v1412_v40 = vpop.f32.mrf.mxu0 }
 0x181   :  { %1469 = vst [vmem:[#allocation2 + $0x4] sm:$0xf] %v1461_v48  ;;  %v1438_v43 = vmax.f32 %v1430_v30, 0.0 }
 0x182   :  { %v1381_v11 = vpop.f32.mrf.mxu3  ;;  %v1359_v52 = vpop.f32.mrf.mxu2 }
 0x183   :  { %v1382_v38 = vadd.f32 %v1381_v11, %v1352_v26  ;;  %v1446_v55 = vadd.f32 %v1438_v43, %v849_v50 }
 0x185   :  { %v1411_v41 = vadd.f32 %v1410_v28, %v1382_v38  ;;  %v1454_v0 = vmax.f32 %v1446_v55, 0.0 }
 0x187   :  { %v1431_v53 = vadd.f32 %v3719_v6, %v1411_v41  ;;  %v1415_v3 = vpop.f32.mrf.mxu0 }
 0x188   :  { %v3773_v17 = vld [vmem:[#allocation2 + $0x4] sm:$0xf] }
 0x189   :  { %v1439_v33 = vmax.f32 %v1431_v53, 0.0  ;;  %v1504_v14 = vunpack.c.l.b16 %v3773_v17  ;;  %v1489_v7 = vld [vmem:[#allocation2 + $0x4] sm:$0xe] }
 0x18a   :  { %v1383_v37 = vpop.f32.mrf.mxu3  ;;  %v1537_v38 = vunpack.c.l.b16 %v1489_v7  ;;  %v1362_v41 = vpop.f32.mrf.mxu2 }
 0x18b   :  { %v1447_v59 = vadd.f32 %v1439_v33, %v851_v54  ;;  %v1384_v61 = vadd.f32 %v1383_v37, %v1354_v36  ;;  %v1513_v44 = vpack.c.b16 %v1504_v14, %v1503_v27  ;;  %v833_v33 = vadd.f32 %v832_v31, %v3674_v4 }
 0x18d   :  { %v1455_v1 = vmax.f32 %v1447_v59, 0.0  ;;  %v1413_v2 = vadd.f32 %v1412_v40, %v1384_v61  ;;  %v1557_v11 = vrot.slane %v1513_v44, 3  ;;  %v835_v40 = vpop.f32.mrf.mxu1  ;;  %v1490_v61 = vld [vmem:[#allocation2 + $0x14] sm:$0x1] }
 0x18f   :  { %v3019_v5 = vpack.c.bf16 %v1455_v1, %v1454_v0  ;;  %v1432_v8 = vadd.f32 %v3719_v6, %v1413_v2  ;;  %v1417_v32 = vpop.f32.mrf.mxu0 }
 0x191   :  { %3050 = vst [vmem:[#allocation2 + $0x8] sm:$0xff] %v3019_v5   ;;  %v1440_v60 = vmax.f32 %v1432_v8, 0.0  ;;  %v857_v8 = vadd.f32 %v3726_v18, %v833_v33 }
 0x192   :  { %v1386_v13 = vpop.f32.mrf.mxu3 }
 0x193   :  { %v1448_v21 = vadd.f32 %v1440_v60, %v853_v10  ;;  %v1387_v23 = vadd.f32 %v1386_v13, %v1357_v62  ;;  %v836_v62 = vadd.f32 %v835_v40, %v3676_v47  ;;  %v1538_v10 = vunpack.c.l.b16 %v1490_v61  ;;  %v1482_v40 = vld [vmem:[#allocation2 + $0x18] sm:$0x8] }
 0x194   :  { %v2973_v61 = vld [vmem:[%s4013_s7 + $0x38] sm:$0xff] }
 0x195   :  { %v1456_v25 = vmax.f32 %v1448_v21, 0.0  ;;  %v1416_v26 = vadd.f32 %v1415_v3, %v1387_v23  ;;  %v859_v31 = vadd.f32 %v3726_v18, %v836_v62  ;;  %2234 = vmatpush.bf16.msrb.mxu0 %v2973_v61 }
 0x197   :  { %v1464_v45 = vpack.c.bf16 %v1456_v25, %v1456_v25  ;;  %v1433_v28 = vadd.f32 %v3719_v6, %v1416_v26  ;;  %v1420_v37 = vpop.f32.mrf.mxu0  ;;  %v837_v25 = vpop.f32.mrf.mxu1 }
 0x198   :  { %v3779_v35 = vld [vmem:[#allocation2 + $0x8] sm:$0xf]  ;;  %v3781_v19 = vld [vmem:[#allocation2 + $0xc] sm:$0xf]  ;;  %v838_v44 = vadd.f32 %v837_v25, %v3678_v51 }
 0x199   :  { %1472 = vst [vmem:[#allocation2 + $0x10] sm:$0xf] %v1464_v45  ;;  %v1441_v24 = vmax.f32 %v1433_v28, 0.0  ;;  %v1505_v42 = vunpack.c.l.b16 %v3779_v35  ;;  %v1506_v9 = vunpack.c.l.b16 %v3781_v19 }
 0x19a   :  { %v1388_v48 = vpop.f32.mrf.mxu3 }
 0x19b   :  { %v1449_v56 = vadd.f32 %v1441_v24, %v855_v29  ;;  %v1389_v16 = vadd.f32 %v1388_v48, %v1359_v52  ;;  %v3785_v30 = vpack.c.b16 %v1506_v9, %v1505_v42  ;;  %v1523_v49 = vpack.c.b16 %v1505_v42, %v1504_v14  ;;  %v1364_v14 = vpop.f32.mrf.mxu2 }
 0x19c   :  { %v1541_v50 = vpack.c.b16 %v1505_v42, %v1537_v38  ;;  %v1542_v42 = vpack.c.b16 %v1538_v10, %v1538_v10 }
 0x19d   :  { %v1457_v34 = vmax.f32 %v1449_v56, 0.0  ;;  %v1418_v36 = vadd.f32 %v1417_v32, %v1389_v16  ;;  %v1558_v12 = vrot.slane %v3785_v30, 3  ;;  %v1527_v63 = vrot.slane %v1523_v49, 5 }
 0x19e   :  { %v1546_v0 = vrot.slane %v1541_v50, 6  ;;  %v1508_v49 = vunpack.c.l.b16 %v1482_v40  ;;  %v2981_v40 = vld [vmem:[%s4013_s7 + $0x78] sm:$0xff] }
 0x19f   :  { %v1465_v39 = vpack.c.bf16 %v1457_v34, %v1457_v34  ;;  %v1559_v43 = vsel %vm1556_vm4, %v1557_v11, %v1558_v12  ;;  %v1434_v54 = vadd.f32 %v3719_v6, %v1418_v36  ;;  %v1560_v21 = vrot.slane %v1527_v63, 3  ;;  %3078 = vmatpush.bf16.msrb.mxu1 %v2981_v40 }
 0x1a0   :  { %v3789_v46 = vld [vmem:[#allocation2 + $0x10] sm:$0xf]  ;;  %1799 = vmatmul.bf16.vlgmr.msra.gmra.mxu1 %v1559_v43  ;;  %v1563_v47 = vrot.slane %v1546_v0, 3  ;;  %v1549_v36 = vrot.slane %v1542_v42, 6  ;;  %v861_v11 = vadd.f32 %v3726_v18, %v838_v44 }
 0x1a1   :  { %v1481_v53 = vld [vmem:[#allocation2 + $0x10] sm:$0x7]  ;;  %1473 = vst [vmem:[#allocation2 + $0x1c] sm:$0xf] %v1465_v39  ;;  %v1521_v55 = vunpack.c.l.b16 %v3789_v46  ;;  %v1442_v1 = vmax.f32 %v1434_v54, 0.0 }
 0x1a2   :  { %v1391_v57 = vpop.f32.mrf.mxu3  ;;  %v1507_v59 = vunpack.c.l.b16 %v1481_v53 }
 0x1a3   :  { %v1524_v22 = vpack.c.b16 %v1521_v55, %v1506_v9  ;;  %v1392_v58 = vadd.f32 %v1391_v57, %v1362_v41  ;;  %v1450_v26 = vadd.f32 %v1442_v1, %v857_v8  ;;  %v1422_v9 = vpop.f32.mrf.mxu0 }
 0x1a4   :  { %v1515_v15 = vpack.c.b16 %v1507_v59, %v1507_v59 }
 0x1a5   :  { %v1421_v2 = vadd.f32 %v1420_v37, %v1392_v58  ;;  %v1528_v3 = vrot.slane %v1524_v22, 5  ;;  %v1547_v5 = vrot.slane %v1524_v22, 6  ;;  %v1458_v48 = vmax.f32 %v1450_v26, 0.0 }
 0x1a6   :  { %v1566_v24 = vrot.slane %v1515_v15, 3 }
 0x1a7   :  { %v1435_v4 = vadd.f32 %v3719_v6, %v1421_v2  ;;  %v1529_v60 = vsel %vm198_vm3, %v1527_v63, %v1528_v3  ;;  %v1548_v13 = vsel %vm1545_vm5, %v1546_v0, %v1547_v5  ;;  %v1550_v51 = vsel %vm1545_vm5, %v1547_v5, %v1549_v36  ;;  %v2972_v0 = vld [vmem:[%s4013_s7 + $0x30] sm:$0xff]  ;;  %v2970_v36 = vld [vmem:[%s4013_s7 + $0x20] sm:$0xff] }
 0x1a8   :  { %v1561_v23 = vrot.slane %v1529_v60, 3  ;;  %v1564_v20 = vrot.slane %v1548_v13, 3  ;;  %v1567_v34 = vsel %vm1556_vm4, %v1558_v12, %v1566_v24  ;;  %v3806_v39 = vld [vmem:[#allocation2 + $0x1c] sm:$0xf]  ;;  %v1568_v53 = vrot.slane %v1528_v3, 3  ;;  %2235 = vmatpush.bf16.msrb.mxu0 %v2972_v0 }
 0x1a9   :  { %v1443_v27 = vmax.f32 %v1435_v4, 0.0  ;;  %v1509_v50 = vunpack.c.l.b16 %v3806_v39  ;;  %v1491_v59 = vld [vmem:[#allocation2 + $0x1c] sm:$0xe] }
 0x1aa   :  { %v1393_v52 = vpop.f32.mrf.mxu3  ;;  %v1562_v45 = vsel %vm1556_vm4, %v1560_v21, %v1561_v23  ;;  %v1565_v28 = vsel %vm1556_vm4, %v1563_v47, %v1564_v20  ;;  %v1569_v57 = vsel %vm1556_vm4, %v1561_v23, %v1568_v53  ;;  %v1539_v1 = vunpack.c.l.b16 %v1491_v59  ;;  %v1492_v23 = vld [vmem:[#allocation2 + $0x2c] sm:$0x1]  ;;  %v2978_v59 = vld [vmem:[%s4013_s7 + $0x60] sm:$0xff]  ;;  %v2985_v0 = vld [vmem:[%s4013_s7 + $0x98] sm:$0xff] }
 0x1ab   :  { %v1451_v29 = vadd.f32 %v1443_v27, %v859_v31  ;;  %v1394_v32 = vadd.f32 %v1393_v52, %v1364_v14  ;;  %1828 = vmatmul.bf16.vlgmr.msra.gmra.mxu2 %v1562_v45  ;;  %1857 = vmatmul.bf16.vlgmr.msrb.gmra.mxu3 %v1565_v28  ;;  %v1516_v37 = vpack.c.b16 %v1509_v50, %v1508_v49  ;;  %v1540_v27 = vunpack.c.l.b16 %v1492_v23 }
 0x1ad   :  { %v1459_v56 = vmax.f32 %v1451_v29, 0.0  ;;  %v1423_v16 = vadd.f32 %v1422_v9, %v1394_v32  ;;  %v1572_v62 = vrot.slane %v1516_v37, 3  ;;  %v1544_v42 = vpack.c.b16 %v1540_v27, %v1540_v27  ;;  %v2974_v27 = vld [vmem:[%s4013_s7 + $0x40] sm:$0xff] }
 0x1af   :  { %v3024_v30 = vpack.c.bf16 %v1459_v56, %v1458_v48  ;;  %v1436_v7 = vadd.f32 %v3719_v6, %v1423_v16  ;;  %v1570_v6 = vrot.slane %v1550_v51, 3  ;;  %v1554_v44 = vrot.slane %v1544_v42, 6  ;;  %v2968_v51 = vld [vmem:[%s4013_s7 + $0x10] sm:$0xff] }
 0x1b0   :  { %1804 = vmatmul.bf16.gmra.mxu1 %v1567_v34  ;;  %v2971_v34 = vld [vmem:[%s4013_s7 + $0x28] sm:$0xff] }
 0x1b1   :  { %3051 = vst [vmem:[#allocation2 + $0x20] sm:$0xff] %v3024_v30   ;;  %v1444_v38 = vmax.f32 %v1436_v7, 0.0  ;;  %v1571_v22 = vsel %vm1556_vm4, %v1564_v20, %v1570_v6  ;;  %2236 = vmatpush.bf16.msrb.mxu0 %v2971_v34  ;;  %v2987_v6 = vld [vmem:[%s4013_s7 + $0xa8] sm:$0xff] }
 0x1b3   :  { %v1452_v43 = vadd.f32 %v1444_v38, %v861_v11  ;;  %v2989_v11 = vld [vmem:[%s4013_s7 + $0xb8] sm:$0xff] }
 0x1b4   :  { %v2969_v38 = vld [vmem:[%s4013_s7 + $0x18] sm:$0xff]  ;;  %2292 = vmatpush.bf16.msrb.mxu2 %v2989_v11  ;;  %3086 = vmatpush.bf16.msra.mxu3 %v2989_v11 }
 0x1b5   :  { %v1460_v41 = vmax.f32 %v1452_v43, 0.0  ;;  %2237 = vmatpush.bf16.msrb.mxu0 %v2970_v36  ;;  %v2988_v43 = vld [vmem:[%s4013_s7 + $0xb0] sm:$0xff] }
 0x1b7   :  { %v1468_v54 = vpack.c.bf16 %v1460_v41, %v1460_v41  ;;  %v2980_v41 = vld [vmem:[%s4013_s7 + $0x70] sm:$0xff] }
 0x1b8   :  { %v3810_v12 = vld [vmem:[#allocation2 + $0x20] sm:$0xf]  ;;  %v3812_v55 = vld [vmem:[#allocation2 + $0x24] sm:$0xf]  ;;  %2293 = vmatpush.bf16.msrb.mxu2 %v2988_v43  ;;  %3079 = vmatpush.bf16.msrb.mxu1 %v2980_v41 }
 0x1b9   :  { %1476 = vst [vmem:[#allocation2 + $0x28] sm:$0xf] %v1468_v54  ;;  %v1510_v18 = vunpack.c.l.b16 %v3810_v12  ;;  %v1511_v33 = vunpack.c.l.b16 %v3812_v55  ;;  %2238 = vmatpush.bf16.msrb.mxu0 %v2969_v38  ;;  %3087 = vmatpush.bf16.msra.mxu3 %v2988_v43  ;;  %v2979_v54 = vld [vmem:[%s4013_s7 + $0x68] sm:$0xff] }
 0x1bb   :  { %1833 = vmatmul.bf16.gmra.mxu2 %v1569_v57  ;;  %1862 = vmatmul.bf16.gmra.mxu3 %v1571_v22  ;;  %v1517_v58 = vpack.c.b16 %v1511_v33, %v1510_v18  ;;  %v1525_v5 = vpack.c.b16 %v1510_v18, %v1509_v50  ;;  %v1543_v8 = vpack.c.b16 %v1510_v18, %v1539_v1  ;;  %v2967_v50 = vld [vmem:[%s4013_s7 + $0x8] sm:$0xff]  ;;  %v2966_v18 = vld [vmem:[%s4013_s7] sm:$0xff]  ;;  %v2977_v1 = vld [vmem:[%s4013_s7 + $0x58] sm:$0xff] }
 0x1bc   :  { %2294 = vmatpush.bf16.msrb.mxu2 %v2987_v6  ;;  %3080 = vmatpush.bf16.msrb.mxu1 %v2979_v54  ;;  %v3875_v22 = vld [vmem:[%s4012_s6] ss:$0 sm:$0xff] }
 0x1bd   :  { %v1573_v63 = vrot.slane %v1517_v58, 3  ;;  %v1530_v15 = vrot.slane %v1525_v5, 5  ;;  %v1551_v21 = vrot.slane %v1543_v8, 6  ;;  %2239 = vmatpush.bf16.msrb.mxu0 %v2968_v51  ;;  %3088 = vmatpush.bf16.msra.mxu3 %v2987_v6  ;;  %v2986_v58 = vld [vmem:[%s4013_s7 + $0xa0] sm:$0xff] }
 0x1bf   :  { %v1574_v2 = vsel %vm1556_vm4, %v1572_v62, %v1573_v63  ;;  %v1575_v14 = vrot.slane %v1530_v15, 3  ;;  %v1578_v45 = vrot.slane %v1551_v21, 3 }
 0x1c0   :  { %v3825_v3 = vld [vmem:[#allocation2 + $0x28] sm:$0xf]  ;;  %1809 = vmatmul.bf16.gmra.mxu1 %v1574_v2  ;;  %2295 = vmatpush.bf16.msrb.mxu2 %v2986_v58 }
 0x1c1   :  { %v1486_v10 = vld [vmem:[#allocation2 + $0x28] sm:$0x7]  ;;  %v1522_v4 = vunpack.c.l.b16 %v3825_v3  ;;  %2240 = vmatpush.bf16.msrb.mxu0 %v2967_v50  ;;  %3081 = vmatpush.bf16.msrb.mxu1 %v2978_v59 }
 0x1c2   :  { %v1512_v13 = vunpack.c.l.b16 %v1486_v10  ;;  %3089 = vmatpush.bf16.msra.mxu3 %v2986_v58 }
 0x1c3   :  { %v1526_v60 = vpack.c.b16 %v1522_v4, %v1511_v33  ;;  %v2976_v4 = vld [vmem:[%s4013_s7 + $0x50] sm:$0xff] }
 0x1c4   :  { %v1518_v26 = vpack.c.b16 %v1512_v13, %v1512_v13  ;;  %2296 = vmatpush.bf16.msrb.mxu2 %v2985_v0 }
 0x1c5   :  { %v1531_v47 = vrot.slane %v1526_v60, 5  ;;  %v1552_v20 = vrot.slane %v1526_v60, 6  ;;  %2241 = vmatpush.bf16.msrb.mxu0 %v2966_v18  ;;  %3082 = vmatpush.bf16.msrb.mxu1 %v2977_v1  ;;  %v2984_v60 = vld [vmem:[%s4013_s7 + $0x90] sm:$0xff] }
 0x1c6   :  { %v1581_v24 = vrot.slane %v1518_v26, 3  ;;  %3090 = vmatpush.bf16.msra.mxu3 %v2985_v0 }
 0x1c7   :  { %v1532_v31 = vsel %vm198_vm3, %v1530_v15, %v1531_v47  ;;  %v1553_v25 = vsel %vm1545_vm5, %v1551_v21, %v1552_v20  ;;  %v1555_v48 = vsel %vm1545_vm5, %v1552_v20, %v1554_v44  ;;  %v1583_v56 = vrot.slane %v1531_v47, 3  ;;  %v2975_v15 = vld [vmem:[%s4013_s7 + $0x48] sm:$0xff] }
 0x1c8   :  { %v1576_v52 = vrot.slane %v1532_v31, 3  ;;  %v1579_v28 = vrot.slane %v1553_v25, 3  ;;  %v1582_v9 = vsel %vm1556_vm4, %v1573_v63, %v1581_v24  ;;  %v1585_v16 = vrot.slane %v1555_v48, 3  ;;  %2297 = vmatpush.bf16.msrb.mxu2 %v2984_v60  ;;  %v2983_v21 = vld [vmem:[%s4013_s7 + $0x88] sm:$0xff]  ;;  %v1922_v25 = vld [vmem:[#allocation3] sm:$0x8] }
 0x1c9   :  { %2263 = vmatpush.bf16.msra.mxu0 %v2981_v40  ;;  %3083 = vmatpush.bf16.msrb.mxu1 %v2976_v4 }
 0x1ca   :  { %v1577_v29 = vsel %vm1556_vm4, %v1575_v14, %v1576_v52  ;;  %v1580_v32 = vsel %vm1556_vm4, %v1578_v45, %v1579_v28  ;;  %v1584_v30 = vsel %vm1556_vm4, %v1576_v52, %v1583_v56  ;;  %v1586_v7 = vsel %vm1556_vm4, %v1579_v28, %v1585_v16  ;;  %3091 = vmatpush.bf16.msra.mxu3 %v2984_v60  ;;  %v2982_v14 = vld [vmem:[%s4013_s7 + $0x80] sm:$0xff] }
 0x1cb   :  { %1838 = vmatmul.bf16.gmra.mxu2 %v1577_v29  ;;  %1867 = vmatmul.bf16.gmra.mxu3 %v1580_v32  ;;  %v1948_v29 = vunpack.c.l.b16 %v1922_v25 }
 0x1cc   :  { %2298 = vmatpush.bf16.msrb.mxu2 %v2983_v21 }
 0x1cd   :  { %2264 = vmatpush.bf16.msra.mxu0 %v2980_v41  ;;  %3084 = vmatpush.bf16.msrb.mxu1 %v2975_v15 }
 0x1ce   :  { %3092 = vmatpush.bf16.msra.mxu3 %v2983_v21 }
 0x1d0   :  { %1814 = vmatmul.bf16.gmra.mxu1 %v1582_v9  ;;  %2299 = vmatpush.bf16.msrb.mxu2 %v2982_v14 }
 0x1d1   :  { %2265 = vmatpush.bf16.msra.mxu0 %v2979_v54  ;;  %3085 = vmatpush.bf16.msrb.mxu1 %v2974_v27 }
 0x1d2   :  { %3093 = vmatpush.bf16.msra.mxu3 %v2982_v14 }
 0x1d5   :  { %2266 = vmatpush.bf16.msra.mxu0 %v2978_v59 }
 0x1d9   :  { %2267 = vmatpush.bf16.msra.mxu0 %v2977_v1 }
 0x1db   :  { %1843 = vmatmul.bf16.gmra.mxu2 %v1584_v30  ;;  %1872 = vmatmul.bf16.gmra.mxu3 %v1586_v7 }
 0x1dd   :  { %2268 = vmatpush.bf16.msra.mxu0 %v2976_v4 }
 0x1e1   :  { %2269 = vmatpush.bf16.msra.mxu0 %v2975_v15 }
 0x1e5   :  { %2270 = vmatpush.bf16.msra.mxu0 %v2974_v27 }
 0x21d   :  { %v1800_v49 = vpop.f32.mrf.mxu1 }
 0x225   :  { %v1802_v53 = vpop.f32.mrf.mxu1 }
 0x22d   :  { %v1805_v62 = vpop.f32.mrf.mxu1 }
 0x22e   :  { %v1829_v33 = vpop.f32.mrf.mxu2  ;;  %v1858_v37 = vpop.f32.mrf.mxu3 }
 0x22f   :  { %v1830_v57 = vadd.f32 %v1829_v33, %v1800_v49 }
 0x231   :  { %v1859_v61 = vadd.f32 %v1858_v37, %v1830_v57 }
 0x233   :  { %v1882_v63 = vadd.f32 %v3875_v22, %v1859_v61 }
 0x235   :  { %v1890_v2 = vmax.f32 %v1882_v63, 0.0  ;;  %v1807_v23 = vpop.f32.mrf.mxu1 }
 0x236   :  { %v1831_v5 = vpop.f32.mrf.mxu2  ;;  %v1860_v8 = vpop.f32.mrf.mxu3 }
 0x237   :  { %v1906_v10 = vpack.c.bf16 %v1890_v2, %v1890_v2  ;;  %v1832_v13 = vadd.f32 %v1831_v5, %v1802_v53  ;;  %v1935_v5 = vld [vmem:[#allocation3 + $0x14] sm:$0x1] }
 0x238   :  { %v1983_v21 = vunpack.c.l.b16 %v1935_v5 }
 0x239   :  { %1914 = vst [vmem:[#allocation3 + $0x4] sm:$0xf] %v1906_v10  ;;  %v1861_v47 = vadd.f32 %v1860_v8, %v1832_v13 }
 0x23b   :  { %v1883_v45 = vadd.f32 %v3875_v22, %v1861_v47 }
 0x23d   :  { %v1891_v42 = vmax.f32 %v1883_v45, 0.0  ;;  %v1810_v7 = vpop.f32.mrf.mxu1 }
 0x23e   :  { %v1834_v20 = vpop.f32.mrf.mxu2  ;;  %v1863_v31 = vpop.f32.mrf.mxu3 }
 0x23f   :  { %v1835_v26 = vadd.f32 %v1834_v20, %v1805_v62 }
 0x240   :  { %v1923_v52 = vld [vmem:[#allocation3 + $0x4] sm:$0xf] }
 0x241   :  { %v1864_v28 = vadd.f32 %v1863_v31, %v1835_v26  ;;  %v1949_v32 = vunpack.c.l.b16 %v1923_v52  ;;  %v1934_v53 = vld [vmem:[#allocation3 + $0x4] sm:$0xe] }
 0x242   :  { %v1982_v33 = vunpack.c.l.b16 %v1934_v53 }
 0x243   :  { %v1884_v24 = vadd.f32 %v3875_v22, %v1864_v28  ;;  %v1958_v44 = vpack.c.b16 %v1949_v32, %v1948_v29 }
 0x245   :  { %v1892_v9 = vmax.f32 %v1884_v24, 0.0  ;;  %v2000_v36 = vrot.slane %v1958_v44, 3  ;;  %v1812_v18 = vpop.f32.mrf.mxu1 }
 0x246   :  { %v1836_v48 = vpop.f32.mrf.mxu2  ;;  %v1865_v56 = vpop.f32.mrf.mxu3 }
 0x247   :  { %v3029_v16 = vpack.c.bf16 %v1892_v9, %v1891_v42  ;;  %v1837_v30 = vadd.f32 %v1836_v48, %v1807_v23  ;;  %v1987_v9 = vpack.c.b16 %v1983_v21, %v1983_v21 }
 0x249   :  { %3052 = vst [vmem:[#allocation3 + $0x8] sm:$0xff] %v3029_v16   ;;  %v1866_v34 = vadd.f32 %v1865_v56, %v1837_v30  ;;  %v2001_v11 = vrot.slane %v3029_v16, 3  ;;  %v3038_v6 = vunpack.c.l.b16 %v3029_v16  ;;  %v1927_v16 = vld [vmem:[#allocation3 + $0x18] sm:$0x8] }
 0x24b   :  { %v1885_v38 = vadd.f32 %v3875_v22, %v1866_v34  ;;  %v2002_v40 = vsel %vm1556_vm4, %v2000_v36, %v2001_v11  ;;  %v1986_v57 = vpack.c.b16 %v3038_v6, %v1982_v33  ;;  %v3913_v59 = vpack.c.b16 %v3038_v6, %v1949_v32 }
 0x24c   :  { %2242 = vmatmul.bf16.vlgmr.msrb.gmra.mxu0 %v2002_v40 }
 0x24d   :  { %v1893_v43 = vmax.f32 %v1885_v38, 0.0  ;;  %v1990_v1 = vrot.slane %v1986_v57, 6  ;;  %v1972_v4 = vrot.slane %v3913_v59, 5  ;;  %v1815_v23 = vpop.f32.mrf.mxu1  ;;  %v1937_v57 = vld [vmem:[#allocation3 + $0x2c] sm:$0x1] }
 0x24e   :  { %v1839_v51 = vpop.f32.mrf.mxu2  ;;  %v1868_v41 = vpop.f32.mrf.mxu3 }
 0x24f   :  { %v1909_v49 = vpack.c.bf16 %v1893_v43, %v1893_v43  ;;  %v1840_v50 = vadd.f32 %v1839_v51, %v1810_v7  ;;  %v2006_v25 = vrot.slane %v1990_v1, 3  ;;  %v1993_v7 = vrot.slane %v1987_v9, 6 }
 0x250   :  { %v1953_v43 = vunpack.c.l.b16 %v1927_v16 }
 0x251   :  { %1917 = vst [vmem:[#allocation3 + $0x10] sm:$0xf] %v1909_v49  ;;  %v1869_v54 = vadd.f32 %v1868_v41, %v1840_v50 }
 0x253   :  { %v1886_v37 = vadd.f32 %v3875_v22, %v1869_v54 }
 0x255   :  { %v1894_v58 = vmax.f32 %v1886_v37, 0.0  ;;  %v1817_v38 = vpop.f32.mrf.mxu1 }
 0x256   :  { %v1841_v61 = vpop.f32.mrf.mxu2  ;;  %v1870_v62 = vpop.f32.mrf.mxu3 }
 0x257   :  { %v1910_v63 = vpack.c.bf16 %v1894_v58, %v1894_v58  ;;  %v1842_v8 = vadd.f32 %v1841_v61, %v1812_v18 }
 0x258   :  { %v3068_v0 = vld [vmem:[#allocation3 + $0xc] sm:$0xff] }
 0x259   :  { %v1926_v2 = vld [vmem:[#allocation3 + $0x10] sm:$0x7]  ;;  %1918 = vst [vmem:[#allocation3 + $0x1c] sm:$0xf] %v1910_v63  ;;  %v1973_v60 = vrot.slane %v3068_v0, 5  ;;  %v1991_v13 = vrot.slane %v3068_v0, 6  ;;  %v1871_v26 = vadd.f32 %v1870_v62, %v1842_v8 }
 0x25a   :  { %v1952_v10 = vunpack.c.l.b16 %v1926_v2  ;;  %v1985_v2 = vunpack.c.l.b16 %v1937_v57 }
 0x25b   :  { %v3919_v47 = vsel %vm198_vm3, %v1972_v4, %v1973_v60  ;;  %v2011_v20 = vrot.slane %v1973_v60, 3  ;;  %v1992_v31 = vsel %vm1545_vm5, %v1990_v1, %v1991_v13  ;;  %v1887_v44 = vadd.f32 %v3875_v22, %v1871_v26 }
 0x25c   :  { %v1960_v15 = vpack.c.b16 %v1952_v10, %v1952_v10  ;;  %v2004_v27 = vrot.slane %v3919_v47, 3  ;;  %v2007_v14 = vrot.slane %v1992_v31, 3  ;;  %v1994_v50 = vsel %vm1545_vm5, %v1991_v13, %v1993_v7 }
 0x25d   :  { %v1895_v34 = vmax.f32 %v1887_v44, 0.0  ;;  %v2013_v18 = vrot.slane %v1994_v50, 3  ;;  %v2003_v7 = vrot.slane %v1972_v4, 3  ;;  %v3954_v4 = vld [vmem:[%s4014_s8] ss:$0 sm:$0xff] }
 0x25e   :  { %v2009_v52 = vrot.slane %v1960_v15, 3  ;;  %v1844_v45 = vpop.f32.mrf.mxu2  ;;  %v1873_v28 = vpop.f32.mrf.mxu3  ;;  %v2012_v32 = vsel %vm1556_vm4, %v2004_v27, %v2011_v20  ;;  %v2008_v24 = vsel %vm1556_vm4, %v2006_v25, %v2007_v14 }
 0x25f   :  { %v1845_v29 = vadd.f32 %v1844_v45, %v1815_v23  ;;  %2276 = vmatmul.bf16.vlgmr.msrb.gmra.mxu1 %v2012_v32  ;;  %2300 = vmatmul.bf16.vlgmr.msrb.gmra.mxu2 %v2008_v24  ;;  %v2014_v62 = vsel %vm1556_vm4, %v2007_v14, %v2013_v18  ;;  %v1900_v18 = vunpack.c.l.bf16 %v3781_v19 }
 0x260   :  { %v2010_v42 = vsel %vm1556_vm4, %v2001_v11, %v2009_v52  ;;  %v1928_v30 = vld [vmem:[#allocation3 + $0x1c] sm:$0xf] }
 0x261   :  { %v1874_v48 = vadd.f32 %v1873_v28, %v1845_v29  ;;  %2247 = vmatmul.bf16.gmra.mxu0 %v2010_v42  ;;  %v1954_v51 = vunpack.c.l.b16 %v1928_v30  ;;  %v1936_v0 = vld [vmem:[#allocation3 + $0x1c] sm:$0xe] }
 0x262   :  { %v1984_v5 = vunpack.c.l.b16 %v1936_v0 }
 0x263   :  { %v1888_v56 = vadd.f32 %v3875_v22, %v1874_v48  ;;  %v1961_v6 = vpack.c.b16 %v1954_v51, %v1953_v43 }
 0x265   :  { %v1896_v36 = vmax.f32 %v1888_v56, 0.0  ;;  %v2015_v58 = vrot.slane %v1961_v6, 3 }
 0x266   :  { %v1846_v40 = vpop.f32.mrf.mxu2  ;;  %v1875_v49 = vpop.f32.mrf.mxu3 }
 0x267   :  { %v3034_v41 = vpack.c.bf16 %v1896_v36, %v1895_v34  ;;  %v1847_v11 = vadd.f32 %v1846_v40, %v1817_v38  ;;  %v2005_v36 = vsel %vm1556_vm4, %v2003_v7, %v2004_v27  ;;  %v1904_v7 = vunpack.c.l.bf16 %v3812_v55 }
 0x269   :  { %3053 = vst [vmem:[#allocation3 + $0x20] sm:$0xff] %v3034_v41   ;;  %v1876_v53 = vadd.f32 %v1875_v49, %v1847_v11  ;;  %v2016_v33 = vrot.slane %v3034_v41, 3  ;;  %v3042_v63 = vunpack.c.l.b16 %v3034_v41 }
 0x26b   :  { %v1889_v54 = vadd.f32 %v3875_v22, %v1876_v53  ;;  %v2017_v1 = vsel %vm1556_vm4, %v2015_v58, %v2016_v33  ;;  %v1970_v8 = vpack.c.b16 %v3042_v63, %v1954_v51  ;;  %v1988_v10 = vpack.c.b16 %v3042_v63, %v1984_v5 }
 0x26c   :  { %v1989_v22 = vpack.c.b16 %v1985_v2, %v1985_v2  ;;  %v1901_v2 = vunpack.c.l.bf16 %v3789_v46 }
 0x26d   :  { %v1897_v37 = vmax.f32 %v1889_v54, 0.0  ;;  %v1975_v60 = vrot.slane %v1970_v8, 5  ;;  %v1995_v15 = vrot.slane %v1988_v10, 6 }
 0x26e   :  { %v1998_v21 = vrot.slane %v1989_v22, 6 }
 0x26f   :  { %v1913_v61 = vpack.c.bf16 %v1897_v37, %v1897_v37  ;;  %2305 = vmatmul.bf16.gmra.mxu2 %v2014_v62  ;;  %v2018_v26 = vrot.slane %v1975_v60, 3  ;;  %v2021_v28 = vrot.slane %v1995_v15, 3 }
 0x271   :  { %1921 = vst [vmem:[#allocation3 + $0x28] sm:$0xf] %v1913_v61  ;;  %2252 = vmatmul.bf16.gmra.mxu0 %v2017_v1 }
 0x278   :  { %v3069_v13 = vld [vmem:[#allocation3 + $0x24] sm:$0xff] }
 0x279   :  { %v1931_v23 = vld [vmem:[#allocation3 + $0x28] sm:$0x7]  ;;  %v1976_v31 = vrot.slane %v3069_v13, 5  ;;  %v1996_v25 = vrot.slane %v3069_v13, 6 }
 0x27a   :  { %v1957_v20 = vunpack.c.l.b16 %v1931_v23  ;;  %v1902_v23 = vunpack.c.l.bf16 %v3806_v39  ;;  %v1903_v39 = vunpack.c.l.bf16 %v3810_v12 }
 0x27b   :  { %v1977_v52 = vsel %vm198_vm3, %v1975_v60, %v1976_v31  ;;  %v1997_v45 = vsel %vm1545_vm5, %v1995_v15, %v1996_v25  ;;  %v1999_v29 = vsel %vm1545_vm5, %v1996_v25, %v1998_v21  ;;  %v2026_v30 = vrot.slane %v1976_v31, 3 }
 0x27c   :  { %v1963_v14 = vpack.c.b16 %v1957_v20, %v1957_v20  ;;  %v2019_v32 = vrot.slane %v1977_v52, 3  ;;  %v2022_v24 = vrot.slane %v1997_v45, 3  ;;  %v2028_v42 = vrot.slane %v1999_v29, 3 }
 0x27e   :  { %v2024_v9 = vrot.slane %v1963_v14, 3  ;;  %v2020_v44 = vsel %vm1556_vm4, %v2018_v26, %v2019_v32  ;;  %v2023_v48 = vsel %vm1556_vm4, %v2021_v28, %v2022_v24  ;;  %v2029_v56 = vsel %vm1556_vm4, %v2022_v24, %v2028_v42 }
 0x27f   :  { %2281 = vmatmul.bf16.gmra.mxu1 %v2020_v44  ;;  %2310 = vmatmul.bf16.gmra.mxu2 %v2023_v48  ;;  %v2027_v34 = vsel %vm1556_vm4, %v2019_v32, %v2026_v30 }
 0x280   :  { %v2025_v16 = vsel %vm1556_vm4, %v2016_v33, %v2024_v9  ;;  %2315 = vmatmul.bf16.vlgmr.msra.gmra.mxu3 %v2029_v56 }
 0x281   :  { %2257 = vmatmul.bf16.gmra.mxu0 %v2025_v16 }
 0x28f   :  { %2286 = vmatmul.bf16.gmra.mxu1 %v2027_v34 }
 0x291   :  { %2271 = vmatmul.bf16.vlgmr.msra.gmra.mxu0 %v2005_v36  ;;  %v1898_v36 = vunpack.c.l.bf16 %v3773_v17 }
 0x2c9   :  { %v2243_v38 = vpop.f32.mrf.mxu0 }
 0x2d1   :  { %v3947_v40 = vpop.f32.mrf.mxu0 }
 0x2dc   :  { %v2277_v11 = vpop.f32.mrf.mxu1 }
 0x2de   :  { %v2248_v43 = vpop.f32.mrf.mxu0 }
 0x2df   :  { %v2278_v59 = vadd.f32 %v2277_v11, %v2248_v43 }
 0x2e2   :  { %v2301_v51 = vpop.f32.mrf.mxu2 }
 0x2e4   :  { %v2279_v27 = vpop.f32.mrf.mxu1 }
 0x2e6   :  { %v2250_v41 = vpop.f32.mrf.mxu0 }
 0x2e7   :  { %v2280_v37 = vadd.f32 %v2279_v27, %v2250_v41 }
 0x2ea   :  { %v3949_v49 = vpop.f32.mrf.mxu2 }
 0x2ee   :  { %v2253_v50 = vpop.f32.mrf.mxu0 }
 0x2f2   :  { %v2306_v47 = vpop.f32.mrf.mxu2 }
 0x2f3   :  { %v2307_v53 = vadd.f32 %v2306_v47, %v2278_v59 }
 0x2f5   :  { %v2327_v6 = vadd.f32 %v3954_v4, %v2307_v53 }
 0x2f6   :  { %v2255_v54 = vpop.f32.mrf.mxu0 }
 0x2f7   :  { %v2335_v33 = vmax.f32 %v2327_v6, 0.0 }
 0x2f9   :  { %v2343_v57 = vadd.f32 %v2335_v33, %v1900_v18  ;;  %v1899_v18 = vunpack.c.l.bf16 %v3779_v35 }
 0x2fa   :  { %v2308_v58 = vpop.f32.mrf.mxu2 }
 0x2fb   :  { %v2351_v61 = vmax.f32 %v2343_v57, 0.0  ;;  %v2309_v62 = vadd.f32 %v2308_v58, %v2280_v37 }
 0x2fc   :  { %v2282_v63 = vpop.f32.mrf.mxu1 }
 0x2fd   :  { %2360 = vst.msk [vmem:[%s4015_s9 + $0x10] sm:$0xff] %vm2357_vm6, %v2351_v61  ;;  %v2328_v0 = vadd.f32 %v3954_v4, %v2309_v62  ;;  %v2283_v8 = vadd.f32 %v2282_v63, %v2253_v50 }
 0x2fe   :  { %v2258_v1 = vpop.f32.mrf.mxu0 }
 0x2ff   :  { %v2336_v5 = vmax.f32 %v2328_v0, 0.0 }
 0x301   :  { %v2344_v19 = vadd.f32 %v2336_v5, %v1901_v2 }
 0x302   :  { %v2311_v10 = vpop.f32.mrf.mxu2 }
 0x303   :  { %v2352_v22 = vmax.f32 %v2344_v19, 0.0  ;;  %v2312_v60 = vadd.f32 %v2311_v10, %v2283_v8  ;;  %v2316_v52 = vpop.f32.mrf.mxu3 }
 0x304   :  { %v2284_v13 = vpop.f32.mrf.mxu1 }
 0x305   :  { %2361 = vst.msk [vmem:[%s4015_s9 + $0x18] sm:$0xff] %vm2357_vm6, %v2352_v22  ;;  %v2329_v15 = vadd.f32 %v3954_v4, %v2312_v60  ;;  %v2285_v46 = vadd.f32 %v2284_v13, %v2255_v54 }
 0x306   :  { %v2260_v21 = vpop.f32.mrf.mxu0 }
 0x307   :  { %v2337_v20 = vmax.f32 %v2329_v15, 0.0 }
 0x309   :  { %v2345_v31 = vadd.f32 %v2337_v20, %v1902_v23 }
 0x30a   :  { %v2313_v25 = vpop.f32.mrf.mxu2 }
 0x30b   :  { %v2353_v26 = vmax.f32 %v2345_v31, 0.0  ;;  %v2314_v14 = vadd.f32 %v2313_v25, %v2285_v46  ;;  %v2318_v11 = vpop.f32.mrf.mxu3 }
 0x30c   :  { %v2287_v45 = vpop.f32.mrf.mxu1 }
 0x30d   :  { %2362 = vst.msk [vmem:[%s4015_s9 + $0x20] sm:$0xff] %vm2357_vm6, %v2353_v26  ;;  %v2330_v28 = vadd.f32 %v3954_v4, %v2314_v14  ;;  %v2288_v29 = vadd.f32 %v2287_v45, %v2258_v1 }
 0x30e   :  { %v2272_v32 = vpop.f32.mrf.mxu0 }
 0x30f   :  { %v2273_v24 = vadd.f32 %v2272_v32, %v2243_v38  ;;  %v2338_v42 = vmax.f32 %v2330_v28, 0.0  ;;  %v2317_v9 = vadd.f32 %v2316_v52, %v2288_v29 }
 0x311   :  { %v2302_v44 = vadd.f32 %v2301_v51, %v2273_v24  ;;  %v2346_v48 = vadd.f32 %v2338_v42, %v1903_v39  ;;  %v2331_v56 = vadd.f32 %v3954_v4, %v2317_v9 }
 0x313   :  { %v2325_v16 = vadd.f32 %v3954_v4, %v2302_v44  ;;  %v2354_v30 = vmax.f32 %v2346_v48, 0.0  ;;  %v2339_v34 = vmax.f32 %v2331_v56, 0.0 }
 0x314   :  { %v2289_v41 = vpop.f32.mrf.mxu1 }
 0x315   :  { %v2333_v43 = vmax.f32 %v2325_v16, 0.0  ;;  %2363 = vst.msk [vmem:[%s4015_s9 + $0x28] sm:$0xff] %vm2357_vm6, %v2354_v30  ;;  %v2347_v12 = vadd.f32 %v2339_v34, %v1904_v7  ;;  %v2290_v38 = vadd.f32 %v2289_v41, %v2260_v21 }
 0x316   :  { %v2274_v51 = vpop.f32.mrf.mxu0 }
 0x317   :  { %v2341_v50 = vadd.f32 %v2333_v43, %v1898_v36  ;;  %v2275_v59 = vadd.f32 %v2274_v51, %v3947_v40  ;;  %v2355_v47 = vmax.f32 %v2347_v12, 0.0  ;;  %v2319_v53 = vadd.f32 %v2318_v11, %v2290_v38 }
 0x318   :  { %v1905_v40 = vunpack.c.l.bf16 %v3825_v3 }
 0x319   :  { %v2349_v55 = vmax.f32 %v2341_v50, 0.0  ;;  %v2304_v27 = vadd.f32 %v3949_v49, %v2275_v59  ;;  %2364 = vst.msk [vmem:[%s4015_s9 + $0x30] sm:$0xff] %vm2357_vm6, %v2355_v47  ;;  %v2332_v17 = vadd.f32 %v3954_v4, %v2319_v53 }
 0x31b   :  { %2358 = vst.msk [vmem:[%s4015_s9] sm:$0xff] %vm2357_vm6, %v2349_v55  ;;  %v2326_v6 = vadd.f32 %v3954_v4, %v2304_v27  ;;  %v2340_v54 = vmax.f32 %v2332_v17, 0.0 }
 0x31d   :  { %v2334_v49 = vmax.f32 %v2326_v6, 0.0  ;;  %v2348_v33 = vadd.f32 %v2340_v54, %v1905_v40 }
 0x31f   :  { %v2342_v37 = vadd.f32 %v2334_v49, %v1899_v18  ;;  %v2356_v57 = vmax.f32 %v2348_v33, 0.0 }
 0x321   :  { %v2350_v58 = vmax.f32 %v2342_v37, 0.0  ;;  %2365 = vst.msk [vmem:[%s4015_s9 + $0x38] sm:$0xff] %vm2357_vm6, %v2356_v57 }
 0x323   :  { %2359 = vst.msk [vmem:[%s4015_s9 + $0x8] sm:$0xff] %vm2357_vm6, %v2350_v58 }

</bundles_post_ra>
